<compile_context>
chip_gen: v5e
topology: v5e:2x2
jax: 0.10.0
libtpu: 0.0.40
codegen_flags: <defaults>
</compile_context>

<pallas_src>
import math

import jax
import jax.numpy as jnp
from jax.experimental import pallas as pl
from jax.experimental.pallas import tpu as pltpu

# ---------------------------------------------------------------------------
# Static shapes (small, consistent with the module: 6*16 conv features => L0=72)
# ---------------------------------------------------------------------------
B = 2                    # batch
SCAN_FRAMES = 4          # in-channels of conv1
L0 = 72                  # scan length: 72 -> 34 -> 15 -> 6 (matches fc's 6*16)
K = 5                    # conv kernel size
STRIDE = 2
L1 = (L0 - K) // STRIDE + 1   # 34
L2 = (L1 - K) // STRIDE + 1   # 15
L3 = (L2 - K) // STRIDE + 1   # 6
CH = 16                  # conv out-channels
HID = 64                 # fc hidden
VEC = 6                  # position(2) + heading(1) + goal(2) + laction(1)

F1 = L1 * CH             # 544  conv1 output, flattened as m = l*CH + c
F2 = L2 * CH             # 240
F3 = L3 * CH             # 96
SCAN_FLAT = SCAN_FRAMES * L0   # 288 (torch NCL flatten: j = ci*L0 + p)
NIN = SCAN_FLAT + VEC          # 294
assert F3 == 6 * 16

# Row offsets inside the packed "small weights" slab (all 8-aligned).
S3_ROW = 0                       # dense conv3 matrix   (F2, F3)
SFH_ROW = S3_ROW + F2            # fc weight, conv part (F3, HID)
SFV_ROW = SFH_ROW + F3           # fc weight, vec part  (VEC, HID), padded to 8 rows
SA_ROW = SFV_ROW + 8             # act weight           (HID, 1)
W_SMALL_ROWS = SA_ROW + HID      # 408


# ---------------------------------------------------------------------------
# Pallas kernel: the entire forward pass, 6 MXU dots, activations in vregs.
# ---------------------------------------------------------------------------
def policy_kernel(x_ref, w1_ref, w2_ref, ws_ref, b_ref, mu_ref):
    """x_ref : (B, 294)  = [scan (torch NCL flat, 288) | pos|heading|goal|laction (6)]
    w1_ref: (288, 544) dense conv1 (NCL-flat in -> channels-last-flat out)
    w2_ref: (544, 240) dense conv2
    ws_ref: (408, 96)  packed [dense conv3 | fc conv part | fc vec part | act]
    b_ref : (5, 544)   packed biases (rows: conv1, conv2, conv3, fc, act)
    mu_ref: (B, 1)
    """
    x = x_ref[...]
    scan = x[:, :SCAN_FLAT]                                   # (B, 288)
    vec = x[:, SCAN_FLAT:]                                    # (B, 6)

    # conv1..conv3 (+ bias + ReLU): each whole layer is ONE matmul against the
    # pre-built dense conv matrix; batch is folded into the matmul rows.
    h = jnp.maximum(jnp.dot(scan, w1_ref[...],
                            preferred_element_type=jnp.float32)
                    + b_ref[0:1, :F1], 0.0)                   # (B, 544)
    h = jnp.maximum(jnp.dot(h, w2_ref[...],
                            preferred_element_type=jnp.float32)
                    + b_ref[1:2, :F2], 0.0)                   # (B, 240)
    h = jnp.maximum(jnp.dot(h, ws_ref[S3_ROW:S3_ROW + F2, :],
                            preferred_element_type=jnp.float32)
                    + b_ref[2:3, :F3], 0.0)                   # (B, 96)

    # fc (+ ReLU): torch flatten permutation is folded into the weight slab.
    h = jnp.maximum(jnp.dot(h, ws_ref[SFH_ROW:SFH_ROW + F3, :HID],
                            preferred_element_type=jnp.float32)
                    + jnp.dot(vec, ws_ref[SFV_ROW:SFV_ROW + VEC, :HID],
                              preferred_element_type=jnp.float32)
                    + b_ref[3:4, :HID], 0.0)                  # (B, 64)

    # act head, mu = pi/2 * tanh(.)
    a = jnp.dot(h, ws_ref[SA_ROW:SA_ROW + HID, 0:1],
                preferred_element_type=jnp.float32) + b_ref[4:5, 0:1]
    mu_ref[...] = (math.pi / 2.0) * jnp.tanh(a)               # (B, 1)


# ---------------------------------------------------------------------------
# One-time parameter conversion (off the per-call path; cache the result)
# ---------------------------------------------------------------------------
def _conv1d_as_dense(w, b, l_in, stride, channels_first_in):
    """Lower Conv1d(w, b, stride) to a dense matmul on flattened activations.

    Output flat layout is always channels-last: m = l*Cout + co.
    Input flat layout: j = ci*l_in + p  if channels_first_in (torch NCL flatten)
                       j = p*Cin  + ci  otherwise (previous layer's output).
    w: (Cout, Cin, K) torch layout, b: (Cout,).
    """
    cout, cin, kk = w.shape
    l_out = (l_in - kk) // stride + 1
    p = jnp.arange(l_in)[:, None]                 # input position
    l = jnp.arange(l_out)[None, :]                # output position
    k = p - stride * l                            # tap index (l_in, l_out)
    valid = (k >= 0) & (k < kk)
    w_klo = jnp.transpose(w, (2, 1, 0))           # (K, Cin, Cout)
    blk = w_klo[jnp.clip(k, 0, kk - 1)]           # (l_in, l_out, Cin, Cout)
    blk = jnp.where(valid[:, :, None, None], blk, 0.0)
    perm = (2, 0, 1, 3) if channels_first_in else (0, 2, 1, 3)
    wd = jnp.transpose(blk, perm).reshape(cin * l_in, l_out * cout)
    bd = jnp.tile(b, l_out)                       # layout m = l*Cout + co
    return wd, bd


def convert_params(params):
    """Convert PyTorch-layout parameters into the packed kernel slabs (call once)."""
    (w1, b1, w2, b2, w3, b3, wfc, bfc, wact, bact) = params

    w1d, b1d = _conv1d_as_dense(w1, b1, L0, STRIDE, channels_first_in=True)   # (288,544)
    w2d, b2d = _conv1d_as_dense(w2, b2, L1, STRIDE, channels_first_in=False)  # (544,240)
    w3d, b3d = _conv1d_as_dense(w3, b3, L2, STRIDE, channels_first_in=False)  # (240, 96)

    # fc weight: torch flatten order j = c*L3 + l  ->  kernel order m = l*CH + c
    wfc_h = jnp.transpose(wfc[:, :F3].reshape(HID, CH, L3), (2, 1, 0)).reshape(F3, HID)
    wfc_v = wfc[:, F3:].T                      # (VEC, HID)
    wact_k = wact.T                            # (HID, 1)

    def pad_to(a, rows, cols):
        return jnp.pad(a, ((0, rows - a.shape[0]), (0, cols - a.shape[1])))

    w_small = jnp.concatenate([
        pad_to(w3d, F2, F3),                   # rows   0:240
        pad_to(wfc_h, F3, F3),                 # rows 240:336 (cols 0:64 used)
        pad_to(wfc_v, 8, F3),                  # rows 336:344 (6 rows, cols 0:64 used)
        pad_to(wact_k, HID, F3),               # rows 344:408 (col 0 used)
    ], axis=0)
    assert w_small.shape == (W_SMALL_ROWS, F3)

    def brow(v):
        return jnp.pad(v, (0, F1 - v.shape[0]))[None, :]

    bias_slab = jnp.concatenate(
        [brow(b1d), brow(b2d), brow(b3d), brow(bfc), brow(bact)], axis=0)  # (5, 544)

    return w1d, w2d, w_small, bias_slab


# ---------------------------------------------------------------------------
# Per-call wrapper (only obs flatten + concat + one pallas_call)
# ---------------------------------------------------------------------------
@jax.jit
def policy_net_forward(scan_ncl, position, heading, goal, laction, kparams):
    w1d, w2d, w_small, bias_slab = kparams
    x = jnp.concatenate(
        [scan_ncl.reshape(scan_ncl.shape[0], -1),       # torch NCL flatten (free)
         position, heading, goal, laction], axis=-1)    # (B, 294)

    vmem = pl.BlockSpec(memory_space=pltpu.MemorySpace.VMEM)
    mu = pl.pallas_call(
        policy_kernel,
        out_shape=jax.ShapeDtypeStruct((x.shape[0], 1), jnp.float32),
        in_specs=[vmem] * 5,
        out_specs=vmem,
    )(x, w1d, w2d, w_small, bias_slab)
    return mu   # TODO(synk): (mu, state) tuple is assembled by the caller.


# ---------------------------------------------------------------------------
# Pure-JAX reference (mirrors the PyTorch forward exactly, torch layouts)
# ---------------------------------------------------------------------------
def _conv1d_ref(x, w, bias, stride=2):
    kk = w.shape[2]
    l_out = (x.shape[2] - kk) // stride + 1
    out = jnp.zeros((x.shape[0], w.shape[0], l_out), jnp.float32)
    for k in range(kk):
        xs = x[:, :, k:k + stride * (l_out - 1) + 1:stride]                 # (B, Cin, l_out)
        out = out + jnp.einsum('bcl,oc->bol', xs, w[:, :, k])
    return out + bias[None, :, None]


def policy_net_ref(scan_ncl, position, heading, goal, laction, params):
    (w1, b1, w2, b2, w3, b3, wfc, bfc, wact, bact) = params
    x = jax.nn.relu(_conv1d_ref(scan_ncl, w1, b1))
    x = jax.nn.relu(_conv1d_ref(x, w2, b2))
    x = jax.nn.relu(_conv1d_ref(x, w3, b3))
    x = x.reshape(x.shape[0], -1)                                           # torch .view(B, -1)
    x = jnp.concatenate([x, position, heading, goal, laction], axis=-1)
    x = jax.nn.relu(x @ wfc.T + bfc)
    return (math.pi / 2.0) * jnp.tanh(x @ wact.T + bact)


# ---------------------------------------------------------------------------
# Main
# ---------------------------------------------------------------------------
if __name__ == "__main__":
    key = jax.random.PRNGKey(0)
    ks = jax.random.split(key, 16)

    # deterministic synthetic parameters (PyTorch shapes)
    w1 = 0.1 * jax.random.normal(ks[0], (CH, SCAN_FRAMES, K), jnp.float32)
    b1 = 0.1 * jax.random.normal(ks[1], (CH,), jnp.float32)
    w2 = 0.1 * jax.random.normal(ks[2], (CH, CH, K), jnp.float32)
    b2 = 0.1 * jax.random.normal(ks[3], (CH,), jnp.float32)
    w3 = 0.1 * jax.random.normal(ks[4], (CH, CH, K), jnp.float32)
    b3 = 0.1 * jax.random.normal(ks[5], (CH,), jnp.float32)
    wfc = 0.1 * jax.random.normal(ks[6], (HID, F3 + VEC), jnp.float32)
    bfc = 0.1 * jax.random.normal(ks[7], (HID,), jnp.float32)
    wact = 0.1 * jax.random.normal(ks[8], (1, HID), jnp.float32)
    bact = 0.1 * jax.random.normal(ks[9], (1,), jnp.float32)
    params = (w1, b1, w2, b2, w3, b3, wfc, bfc, wact, bact)

    # one-time parameter conversion / packing (kept off the per-call path)
    kparams = jax.block_until_ready(convert_params(params))

    # deterministic synthetic observation (PyTorch NCL scan layout)
    scan = jax.random.normal(ks[10], (B, SCAN_FRAMES, L0), jnp.float32)
    position = jax.random.normal(ks[11], (B, 2), jnp.float32)
    heading = jax.random.normal(ks[12], (B, 1), jnp.float32)
    goal = jax.random.normal(ks[13], (B, 2), jnp.float32)
    laction = jax.random.normal(ks[14], (B, 1), jnp.float32)

    mu = policy_net_forward(scan, position, heading, goal, laction, kparams)
    mu = jax.block_until_ready(mu)

    mu_ref = policy_net_ref(scan, position, heading, goal, laction, params)
    assert mu.shape == (B, 1)
    assert jnp.allclose(mu, mu_ref, atol=1e-4, rtol=1e-4), (mu, mu_ref)

    print("KERNEL_OK")
</pallas_src>

<mosaic_0001>
module attributes {stable_mosaic.version = 11 : i64} {
  func.func @policy_kernel(%arg0: memref<2x294xf32, #tpu.memory_space<vmem>>, %arg1: memref<288x544xf32, #tpu.memory_space<vmem>>, %arg2: memref<544x240xf32, #tpu.memory_space<vmem>>, %arg3: memref<408x96xf32, #tpu.memory_space<vmem>>, %arg4: memref<5x544xf32, #tpu.memory_space<vmem>>, %arg5: memref<2x1xf32, #tpu.memory_space<vmem>>) attributes {dimension_semantics = [], scalar_prefetch = 0 : i64, scratch_operands = 0 : i64, tpu.core_type = #tpu.core_type<tc>} {
    %c0 = arith.constant 0 : index
    %c0_0 = arith.constant 0 : index
    %0 = vector.load %arg0[%c0, %c0_0] : memref<2x294xf32, #tpu.memory_space<vmem>>, vector<2x294xf32>
    %1 = vector.extract_strided_slice %0 {offsets = [0, 0], sizes = [2, 288], strides = [1, 1]} : vector<2x294xf32> to vector<2x288xf32>
    %2 = vector.extract_strided_slice %0 {offsets = [0, 288], sizes = [2, 6], strides = [1, 1]} : vector<2x294xf32> to vector<2x6xf32>
    %c0_1 = arith.constant 0 : index
    %c0_2 = arith.constant 0 : index
    %3 = vector.load %arg1[%c0_1, %c0_2] : memref<288x544xf32, #tpu.memory_space<vmem>>, vector<288x544xf32>
    %cst = arith.constant dense<0.000000e+00> : vector<2x544xf32>
    %4 = tpu.matmul %1, %3, %cst {dimension_numbers = #tpu.dot_dimension_numbers<[1], [0], [0], [1], [0, 0, 1, 1], [], []>} : vector<2x288xf32>, vector<288x544xf32>, vector<2x544xf32> -> vector<2x544xf32>
    %c0_3 = arith.constant 0 : index
    %c0_4 = arith.constant 0 : index
    %5 = vector.load %arg4[%c0_3, %c0_4] : memref<5x544xf32, #tpu.memory_space<vmem>>, vector<1x544xf32>
    %6 = vector.broadcast %5 : vector<1x544xf32> to vector<2x544xf32>
    %7 = arith.addf %4, %6 : vector<2x544xf32>
    %cst_5 = arith.constant 0.000000e+00 : f32
    %8 = vector.broadcast %cst_5 : f32 to vector<2x544xf32>
    %9 = arith.maximumf %7, %8 : vector<2x544xf32>
    %c0_6 = arith.constant 0 : index
    %c0_7 = arith.constant 0 : index
    %10 = vector.load %arg2[%c0_6, %c0_7] : memref<544x240xf32, #tpu.memory_space<vmem>>, vector<544x240xf32>
    %cst_8 = arith.constant dense<0.000000e+00> : vector<2x240xf32>
    %11 = tpu.matmul %9, %10, %cst_8 {dimension_numbers = #tpu.dot_dimension_numbers<[1], [0], [0], [1], [0, 0, 1, 1], [], []>} : vector<2x544xf32>, vector<544x240xf32>, vector<2x240xf32> -> vector<2x240xf32>
    %c1 = arith.constant 1 : index
    %c0_9 = arith.constant 0 : index
    %12 = vector.load %arg4[%c1, %c0_9] : memref<5x544xf32, #tpu.memory_space<vmem>>, vector<1x240xf32>
    %13 = vector.broadcast %12 : vector<1x240xf32> to vector<2x240xf32>
    %14 = arith.addf %11, %13 : vector<2x240xf32>
    %cst_10 = arith.constant 0.000000e+00 : f32
    %15 = vector.broadcast %cst_10 : f32 to vector<2x240xf32>
    %16 = arith.maximumf %14, %15 : vector<2x240xf32>
    %c0_11 = arith.constant 0 : index
    %c0_12 = arith.constant 0 : index
    %17 = vector.load %arg3[%c0_11, %c0_12] : memref<408x96xf32, #tpu.memory_space<vmem>>, vector<240x96xf32>
    %cst_13 = arith.constant dense<0.000000e+00> : vector<2x96xf32>
    %18 = tpu.matmul %16, %17, %cst_13 {dimension_numbers = #tpu.dot_dimension_numbers<[1], [0], [0], [1], [0, 0, 1, 1], [], []>} : vector<2x240xf32>, vector<240x96xf32>, vector<2x96xf32> -> vector<2x96xf32>
    %c2 = arith.constant 2 : index
    %c0_14 = arith.constant 0 : index
    %19 = vector.load %arg4[%c2, %c0_14] : memref<5x544xf32, #tpu.memory_space<vmem>>, vector<1x96xf32>
    %20 = vector.broadcast %19 : vector<1x96xf32> to vector<2x96xf32>
    %21 = arith.addf %18, %20 : vector<2x96xf32>
    %cst_15 = arith.constant 0.000000e+00 : f32
    %22 = vector.broadcast %cst_15 : f32 to vector<2x96xf32>
    %23 = arith.maximumf %21, %22 : vector<2x96xf32>
    %c240 = arith.constant 240 : index
    %c0_16 = arith.constant 0 : index
    %24 = vector.load %arg3[%c240, %c0_16] : memref<408x96xf32, #tpu.memory_space<vmem>>, vector<96x64xf32>
    %cst_17 = arith.constant dense<0.000000e+00> : vector<2x64xf32>
    %25 = tpu.matmul %23, %24, %cst_17 {dimension_numbers = #tpu.dot_dimension_numbers<[1], [0], [0], [1], [0, 0, 1, 1], [], []>} : vector<2x96xf32>, vector<96x64xf32>, vector<2x64xf32> -> vector<2x64xf32>
    %c336 = arith.constant 336 : index
    %c0_18 = arith.constant 0 : index
    %26 = vector.load %arg3[%c336, %c0_18] : memref<408x96xf32, #tpu.memory_space<vmem>>, vector<6x64xf32>
    %cst_19 = arith.constant dense<0.000000e+00> : vector<2x64xf32>
    %27 = tpu.matmul %2, %26, %cst_19 {dimension_numbers = #tpu.dot_dimension_numbers<[1], [0], [0], [1], [0, 0, 1, 1], [], []>} : vector<2x6xf32>, vector<6x64xf32>, vector<2x64xf32> -> vector<2x64xf32>
    %28 = arith.addf %25, %27 : vector<2x64xf32>
    %c3 = arith.constant 3 : index
    %c0_20 = arith.constant 0 : index
    %29 = vector.load %arg4[%c3, %c0_20] : memref<5x544xf32, #tpu.memory_space<vmem>>, vector<1x64xf32>
    %30 = vector.broadcast %29 : vector<1x64xf32> to vector<2x64xf32>
    %31 = arith.addf %28, %30 : vector<2x64xf32>
    %cst_21 = arith.constant 0.000000e+00 : f32
    %32 = vector.broadcast %cst_21 : f32 to vector<2x64xf32>
    %33 = arith.maximumf %31, %32 : vector<2x64xf32>
    %c344 = arith.constant 344 : index
    %c0_22 = arith.constant 0 : index
    %34 = vector.load %arg3[%c344, %c0_22] : memref<408x96xf32, #tpu.memory_space<vmem>>, vector<64x1xf32>
    %cst_23 = arith.constant dense<0.000000e+00> : vector<2x1xf32>
    %35 = tpu.matmul %33, %34, %cst_23 {dimension_numbers = #tpu.dot_dimension_numbers<[1], [0], [0], [1], [0, 0, 1, 1], [], []>} : vector<2x64xf32>, vector<64x1xf32>, vector<2x1xf32> -> vector<2x1xf32>
    %c4 = arith.constant 4 : index
    %c0_24 = arith.constant 0 : index
    %36 = vector.load %arg4[%c4, %c0_24] : memref<5x544xf32, #tpu.memory_space<vmem>>, vector<1x1xf32>
    %37 = vector.broadcast %36 : vector<1x1xf32> to vector<2x1xf32>
    %38 = arith.addf %35, %37 : vector<2x1xf32>
    %39 = math.tanh %38 : vector<2x1xf32>
    %cst_25 = arith.constant 1.57079637 : f32
    %40 = vector.broadcast %cst_25 : f32 to vector<2x1xf32>
    %41 = arith.mulf %40, %39 : vector<2x1xf32>
    %c0_26 = arith.constant 0 : index
    %c0_27 = arith.constant 0 : index
    %42 = vector.load %arg5[%c0_26, %c0_27] : memref<2x1xf32, #tpu.memory_space<vmem>>, vector<2x1xf32>
    tpu.vector_store %arg5[%c0_26, %c0_27], %41 {strides = array<i32>} : memref<2x1xf32, #tpu.memory_space<vmem>>, vector<2x1xf32>,
    return
  }
}

</mosaic_0001>

<bundles_post_ra>
// kernel: policy_net_forward.1
= control target key start
LH: loop header
LB: loop body
LE: loop exit
PB: predicated region body
PF: predicated region fallthrough
CT: control target
= control target key end

     0   :  { %10 = vsyncpa [#allocation3], 0  ;;  %s1439_s0 = inlined_call_operand.vmem [shape: f32[2,294], index: 0, kind: input, shape index: {}]   ;;  %s1440_s1 = inlined_call_operand.hbm [shape: f32[288,544], index: 1, kind: input, shape index: {}]   ;;  %s1441_s2 = inlined_call_operand.hbm [shape: f32[544,240], index: 2, kind: input, shape index: {}]   ;;  %s1442_s3 = inlined_call_operand.vmem [shape: f32[408,96], index: 3, kind: input, shape index: {}]   ;;  %s1443_s4 = inlined_call_operand.vmem [shape: f32[5,544], index: 4, kind: input, shape index: {}]   ;;  %s1444_s5 = inlined_call_operand.vmem [shape: f32[2,1], index: 5, kind: output, shape index: {}]  }
   0x1   :  { %s18_s20 = sshll.u32 %s1440_s1, 4  ;;  %s19_s20 = int_to_ptr.hbm [resolvable:$true] %s18_s20 }
   0x2   :  { %11 = vsyncpa [#allocation5], 0  ;;  %s1174_s21 = smov [#allocation2]   ;;  %s31_s25 = sshll.u32 %s1441_s2, 4  ;;  %s32_s25 = int_to_ptr.hbm [resolvable:$true] %s31_s25 }
   0x3   :  { %s20_s22 = sshll.u32 %s1174_s21, 4  ;;  %s1175_s26 = smov 640   ;;  %s21_s22 = int_to_ptr.vmem [resolvable:$true] %s20_s22 }
   0x4   :  { %s1176_s27 = smov 40   ;;  %s1177_s28 = smov [#allocation4]  }
   0x5   :  { %26 = dma.hbm_to_vmem [thread:$0]  %s19_s20, 23040, %s21_s22, [#allocation3], %s1175_s26, %s1175_s26, %s1176_s27  }
   0x6   :  { %s33_s29 = sshll.u32 %s1177_s28, 4  ;;  %s1178_s30 = smov 256   ;;  %s34_s29 = int_to_ptr.vmem [resolvable:$true] %s33_s29 }
   0x7   :  { %s1179_s6 = smov 16  }
   0x8   :  { %39 = dma.hbm_to_vmem [thread:$0]  %s32_s25, 17408, %s34_s29, [#allocation5], %s1178_s30, %s1178_s30, %s1179_s6  }
   0x9   :  { %1170 = dma.done.wait [#allocation3], 23040  }
   0xa   :  { %1171 = vsyncadd [#allocation3], 4294944256 }
   0xb   :  { %1172 = dma.done.wait [#allocation5], 17408  }
   0xc   :  { %1173 = vsyncadd [#allocation5], 4294949888  ;;  %v228_v0 = vld [vmem:[#allocation2 + $0x578] sm:$0xff]  ;;  %v129_v1 = vld [vmem:[#allocation2 + $0x260] sm:$0xff]  ;;  %vm254_vm0 = vcmask 261120   ;;  %s1180_s16 = smov 96  }
   0xd   :  { %v223_v2 = vld [vmem:[#allocation2 + $0x550] sm:$0xff]  ;;  %309 = vmatpush.msra.mxu2 %v228_v0  ;;  %317 = vmatpush.msra.mxu3 %v129_v1  ;;  %v124_v3 = vld [vmem:[#allocation2 + $0x238] sm:$0xff]  ;;  %v218_v5 = vld [vmem:[#allocation2 + $0x528] sm:$0xff]  ;;  %vm941_vm1 = vcmask 916480   ;;  %vm1006_vm2 = vcmask 1045504   ;;  %vm1003_vm3 = vcmask 48128  }
   0xe   :  { %v208_v4 = vld [vmem:[#allocation2 + $0x4d8] sm:$0xff]  ;;  %v119_v6 = vld [vmem:[#allocation2 + $0x210] sm:$0xff]  ;;  %v213_v10 = vld [vmem:[#allocation2 + $0x500] sm:$0xff]  ;;  %vm1030_vm4 = vcmask 785408   ;;  %vm1066_vm5 = vcmask 523264   ;;  %vm1092_vm6 = vcmask 1024  }
   0xf   :  { %277 = vmatpush.msra.mxu1 %v208_v4  ;;  %v128_v7 = vld [vmem:[#allocation2 + $0x258] sm:$0xff]  ;;  %v203_v8 = vld [vmem:[#allocation2 + $0x4b0] sm:$0xff]  ;;  %310 = vmatpush.msra.mxu2 %v223_v2  ;;  %v114_v11 = vld [vmem:[#allocation2 + $0x1e8] sm:$0xff] }
  0x10   :  { %318 = vmatpush.msra.mxu3 %v124_v3  ;;  %v123_v9 = vld [vmem:[#allocation2 + $0x230] sm:$0xff]  ;;  %257 = vmatpush.msra.mxu0 %v128_v7  ;;  %v198_v12 = vld [vmem:[#allocation2 + $0x488] sm:$0xff]  ;;  %v209_v13 = vld [vmem:[#allocation2 + $0x4e0] sm:$0xff] }
  0x11   :  { %278 = vmatpush.msra.mxu1 %v203_v8  ;;  %311 = vmatpush.msra.mxu2 %v218_v5  ;;  %v118_v14 = vld [vmem:[#allocation2 + $0x208] sm:$0xff]  ;;  %v109_v15 = vld [vmem:[#allocation2 + $0x1c0] sm:$0xff]  ;;  %v204_v17 = vld [vmem:[#allocation2 + $0x4b8] sm:$0xff] }
  0x12   :  { %319 = vmatpush.msra.mxu3 %v119_v6  ;;  %258 = vmatpush.msra.mxu0 %v123_v9  ;;  %v193_v16 = vld [vmem:[#allocation2 + $0x460] sm:$0xff]  ;;  %v104_v19 = vld [vmem:[#allocation2 + $0x198] sm:$0xff]  ;;  %v199_v21 = vld [vmem:[#allocation2 + $0x490] sm:$0xff] }
  0x13   :  { %279 = vmatpush.msra.mxu1 %v198_v12  ;;  %312 = vmatpush.msra.mxu2 %v213_v10  ;;  %v113_v18 = vld [vmem:[#allocation2 + $0x1e0] sm:$0xff]  ;;  %v188_v20 = vld [vmem:[#allocation2 + $0x438] sm:$0xff]  ;;  %v99_v23 = vld [vmem:[#allocation2 + $0x170] sm:$0xff] }
  0x14   :  { %320 = vmatpush.msra.mxu3 %v114_v11  ;;  %259 = vmatpush.msra.mxu0 %v118_v14  ;;  %v108_v22 = vld [vmem:[#allocation2 + $0x1b8] sm:$0xff]  ;;  %v183_v24 = vld [vmem:[#allocation2 + $0x410] sm:$0xff]  ;;  %v194_v25 = vld [vmem:[#allocation2 + $0x468] sm:$0xff] }
  0x15   :  { %337 = vmatpush.msrb.mxu2 %v209_v13  ;;  %280 = vmatpush.msra.mxu1 %v193_v16  ;;  %v103_v26 = vld [vmem:[#allocation2 + $0x190] sm:$0xff]  ;;  %v94_v27 = vld [vmem:[#allocation2 + $0x148] sm:$0xff]  ;;  %v189_v29 = vld [vmem:[#allocation2 + $0x440] sm:$0xff] }
  0x16   :  { %321 = vmatpush.msra.mxu3 %v109_v15  ;;  %260 = vmatpush.msra.mxu0 %v113_v18  ;;  %v178_v28 = vld [vmem:[#allocation2 + $0x3e8] sm:$0xff]  ;;  %v89_v31 = vld [vmem:[#allocation2 + $0x120] sm:$0xff]  ;;  %v184_v33 = vld [vmem:[#allocation2 + $0x418] sm:$0xff] }
  0x17   :  { %338 = vmatpush.msrb.mxu2 %v204_v17  ;;  %281 = vmatpush.msra.mxu1 %v188_v20  ;;  %v98_v30 = vld [vmem:[#allocation2 + $0x168] sm:$0xff]  ;;  %v173_v32 = vld [vmem:[#allocation2 + $0x3c0] sm:$0xff]  ;;  %v84_v35 = vld [vmem:[#allocation2 + $0xf8] sm:$0xff] }
  0x18   :  { %322 = vmatpush.msra.mxu3 %v104_v19  ;;  %261 = vmatpush.msra.mxu0 %v108_v22  ;;  %v93_v34 = vld [vmem:[#allocation2 + $0x140] sm:$0xff]  ;;  %v168_v36 = vld [vmem:[#allocation2 + $0x398] sm:$0xff]  ;;  %v179_v37 = vld [vmem:[#allocation2 + $0x3f0] sm:$0xff] }
  0x19   :  { %339 = vmatpush.msrb.mxu2 %v199_v21  ;;  %282 = vmatpush.msra.mxu1 %v183_v24  ;;  %v88_v38 = vld [vmem:[#allocation2 + $0x118] sm:$0xff]  ;;  %v79_v39 = vld [vmem:[#allocation2 + $0xd0] sm:$0xff]  ;;  %v174_v41 = vld [vmem:[#allocation2 + $0x3c8] sm:$0xff] }
  0x1a   :  { %323 = vmatpush.msra.mxu3 %v99_v23  ;;  %262 = vmatpush.msra.mxu0 %v103_v26  ;;  %v163_v40 = vld [vmem:[#allocation2 + $0x370] sm:$0xff]  ;;  %v74_v43 = vld [vmem:[#allocation2 + $0xa8] sm:$0xff]  ;;  %v169_v45 = vld [vmem:[#allocation2 + $0x3a0] sm:$0xff] }
  0x1b   :  { %340 = vmatpush.msrb.mxu2 %v194_v25  ;;  %283 = vmatpush.msra.mxu1 %v178_v28  ;;  %v83_v42 = vld [vmem:[#allocation2 + $0xf0] sm:$0xff]  ;;  %v158_v44 = vld [vmem:[#allocation2 + $0x348] sm:$0xff]  ;;  %v52_v47 = vld [vmem:[%s1439_s0] sm:$0x3f] }
  0x1c   :  { %324 = vmatpush.msra.mxu3 %v94_v27  ;;  %263 = vmatpush.msra.mxu0 %v98_v30  ;;  %v78_v46 = vld [vmem:[#allocation2 + $0xc8] sm:$0xff]  ;;  %v69_v48 = vld [vmem:[#allocation2 + $0x80] sm:$0xff]  ;;  %248 = vst [vmem:[#allocation1] ss:$4 sm:$0xff] %v52_v47  ;;  %v164_v50 = vld [vmem:[#allocation2 + $0x378] sm:$0xff] }
  0x1d   :  { %341 = vmatpush.msrb.mxu2 %v189_v29  ;;  %284 = vmatpush.msra.mxu1 %v173_v32  ;;  %v153_v49 = vld [vmem:[#allocation2 + $0x320] sm:$0xff]  ;;  %v64_v52 = vld [vmem:[#allocation2 + $0x58] sm:$0xff]  ;;  %v159_v54 = vld [vmem:[#allocation2 + $0x350] sm:$0xff] }
  0x1e   :  { %325 = vmatpush.msra.mxu3 %v89_v31  ;;  %264 = vmatpush.msra.mxu0 %v93_v34  ;;  %v73_v51 = vld [vmem:[#allocation2 + $0xa0] sm:$0xff]  ;;  %v148_v53 = vld [vmem:[#allocation2 + $0x2f8] sm:$0xff]  ;;  %v59_v56 = vld [vmem:[#allocation2 + $0x30] sm:$0xff] }
  0x1f   :  { %342 = vmatpush.msrb.mxu2 %v184_v33  ;;  %285 = vmatpush.msra.mxu1 %v168_v36  ;;  %v68_v55 = vld [vmem:[#allocation2 + $0x78] sm:$0xff]  ;;  %v143_v57 = vld [vmem:[#allocation2 + $0x2d0] sm:$0xff]  ;;  %v154_v58 = vld [vmem:[#allocation2 + $0x328] sm:$0xff] }
  0x20   :  { %326 = vmatpush.msra.mxu3 %v84_v35  ;;  %265 = vmatpush.msra.mxu0 %v88_v38  ;;  %v63_v59 = vld [vmem:[#allocation2 + $0x50] sm:$0xff]  ;;  %v54_v60 = vld [vmem:[#allocation2 + $0x8] sm:$0xff]  ;;  %v149_v61 = vld [vmem:[#allocation2 + $0x300] sm:$0xff] }
  0x21   :  { %343 = vmatpush.msrb.mxu2 %v179_v37  ;;  %286 = vmatpush.msra.mxu1 %v163_v40  ;;  %v138_v62 = vld [vmem:[#allocation2 + $0x2a8] sm:$0xff]  ;;  %v144_v4 = vld [vmem:[#allocation2 + $0x2d8] sm:$0xff]  ;;  %v205_v5 = vld [vmem:[#allocation2 + $0x4c0] sm:$0xff] }
  0x22   :  { %327 = vmatpush.msra.mxu3 %v79_v39  ;;  %266 = vmatpush.msra.mxu0 %v83_v42  ;;  %v210_v63 = vld [vmem:[#allocation2 + $0x4e8] sm:$0xff]  ;;  %v133_v6 = vld [vmem:[#allocation2 + $0x280] sm:$0xff]  ;;  %v139_v8 = vld [vmem:[#allocation2 + $0x2b0] sm:$0xff] }
  0x23   :  { %344 = vmatpush.msrb.mxu2 %v174_v41  ;;  %287 = vmatpush.msra.mxu1 %v158_v44  ;;  %v1220_v0 = vld.sshfl [vmem:[#allocation1 + $0x10] sm:$0xff pattern:$0x73625140]  ;;  %v1222_v2 = vld.sshfl [vmem:[#allocation1] sm:$0xff pattern:$0x73625140] }
  0x24   :  { %328 = vmatpush.msra.mxu3 %v74_v43  ;;  %267 = vmatpush.msra.mxu0 %v78_v46  ;;  %v58_v1 = vld [vmem:[#allocation2 + $0x28] sm:$0xff]  ;;  %v1224_v3 = vld.sshfl [vmem:[#allocation1 + $0x8] sm:$0xff pattern:$0x73625140]  ;;  %v200_v10 = vld [vmem:[#allocation2 + $0x498] sm:$0xff] }
  0x25   :  { %345 = vmatpush.msrb.mxu2 %v169_v45  ;;  %288 = vmatpush.msra.mxu1 %v153_v49  ;;  %999 = vst [vmem:[#allocation1] ss:$4 sm:$0xff] %v52_v47  ;;  %v53_v7 = vld [vmem:[#allocation2] sm:$0xff]  ;;  %v130_v9 = vld [vmem:[#allocation2 + $0x268] sm:$0xff]  ;;  %v195_v14 = vld [vmem:[#allocation2 + $0x470] sm:$0xff] }
  0x26   :  { %329 = vmatpush.msra.mxu3 %v69_v48  ;;  %268 = vmatpush.msra.mxu0 %v73_v51  ;;  %v229_v11 = vld [vmem:[#allocation2 + $0x580] sm:$0xff]  ;;  %v134_v12 = vld [vmem:[#allocation2 + $0x288] sm:$0xff]  ;;  %v224_v15 = vld [vmem:[#allocation2 + $0x558] sm:$0xff] }
  0x27   :  { %346 = vmatpush.msrb.mxu2 %v164_v50  ;;  %289 = vmatpush.msra.mxu1 %v148_v53  ;;  %v125_v13 = vld [vmem:[#allocation2 + $0x240] sm:$0xff]  ;;  %v131_v16 = vld [vmem:[#allocation2 + $0x270] sm:$0xff]  ;;  %v120_v17 = vld [vmem:[#allocation2 + $0x218] sm:$0xff] }
  0x28   :  { %330 = vmatpush.msra.mxu3 %v64_v52  ;;  %269 = vmatpush.msra.mxu0 %v68_v55  ;;  %v190_v18 = vld [vmem:[#allocation2 + $0x448] sm:$0xff]  ;;  %v219_v19 = vld [vmem:[#allocation2 + $0x530] sm:$0xff]  ;;  %v185_v22 = vld [vmem:[#allocation2 + $0x420] sm:$0xff] }
  0x29   :  { %347 = vmatpush.msrb.mxu2 %v159_v54  ;;  %290 = vmatpush.msra.mxu1 %v143_v57  ;;  %v126_v20 = vld [vmem:[#allocation2 + $0x248] sm:$0xff]  ;;  %v115_v21 = vld [vmem:[#allocation2 + $0x1f0] sm:$0xff]  ;;  %v121_v24 = vld [vmem:[#allocation2 + $0x220] sm:$0xff] }
  0x2a   :  { %331 = vmatpush.msra.mxu3 %v59_v56  ;;  %270 = vmatpush.msra.mxu0 %v63_v59  ;;  %v214_v23 = vld [vmem:[#allocation2 + $0x508] sm:$0xff]  ;;  %v180_v26 = vld [vmem:[#allocation2 + $0x3f8] sm:$0xff]  ;;  %v105_v29 = vld [vmem:[#allocation2 + $0x1a0] sm:$0xff] }
  0x2b   :  { %348 = vmatpush.msrb.mxu2 %v154_v58  ;;  %291 = vmatpush.msra.mxu1 %v138_v62  ;;  %v110_v25 = vld [vmem:[#allocation2 + $0x1c8] sm:$0xff]  ;;  %v116_v28 = vld [vmem:[#allocation2 + $0x1f8] sm:$0xff]  ;;  %v175_v30 = vld [vmem:[#allocation2 + $0x3d0] sm:$0xff] }
  0x2c   :  { %332 = vmatpush.msra.mxu3 %v54_v60  ;;  %1100 = vmatmul.msk.f32.vlgmr.msra.gmra.mxu2 %vm254_vm0, %v1220_v0  ;;  %v230_v27 = vld [vmem:[#allocation2 + $0x588] sm:$0xff]  ;;  %v225_v31 = vld [vmem:[#allocation2 + $0x560] sm:$0xff]  ;;  %v111_v32 = vld [vmem:[#allocation2 + $0x1d0] sm:$0xff] }
  0x2d   :  { %349 = vmatpush.msrb.mxu2 %v149_v61  ;;  %271 = vmatpush.msra.mxu0 %v58_v1  ;;  %v100_v33 = vld [vmem:[#allocation2 + $0x178] sm:$0xff]  ;;  %v170_v34 = vld [vmem:[#allocation2 + $0x3a8] sm:$0xff]  ;;  %v95_v37 = vld [vmem:[#allocation2 + $0x150] sm:$0xff] }
  0x2e   :  { %397 = vmatpush.msrb.mxu3 %v210_v63  ;;  %292 = vmatpush.msra.mxu1 %v133_v6  ;;  %v220_v35 = vld [vmem:[#allocation2 + $0x538] sm:$0xff]  ;;  %v106_v36 = vld [vmem:[#allocation2 + $0x1a8] sm:$0xff]  ;;  %v165_v38 = vld [vmem:[#allocation2 + $0x380] sm:$0xff] }
  0x2f   :  { %350 = vmatpush.msrb.mxu2 %v144_v4  ;;  %272 = vmatpush.msra.mxu0 %v53_v7  ;;  %v215_v39 = vld [vmem:[#allocation2 + $0x510] sm:$0xff]  ;;  %v101_v40 = vld [vmem:[#allocation2 + $0x180] sm:$0xff]  ;;  %v90_v42 = vld [vmem:[#allocation2 + $0x128] sm:$0xff] }
  0x30   :  { %398 = vmatpush.msrb.mxu3 %v205_v5  ;;  %377 = vmatpush.msrb.mxu1 %v130_v9  ;;  %v211_v41 = vld [vmem:[#allocation2 + $0x4f0] sm:$0xff]  ;;  %v160_v43 = vld [vmem:[#allocation2 + $0x358] sm:$0xff]  ;;  %v206_v45 = vld [vmem:[#allocation2 + $0x4c8] sm:$0xff] }
  0x31   :  { %351 = vmatpush.msrb.mxu2 %v139_v8  ;;  %369 = vmatpush.msrb.mxu0 %v229_v11  ;;  %v96_v44 = vld [vmem:[#allocation2 + $0x158] sm:$0xff]  ;;  %v85_v46 = vld [vmem:[#allocation2 + $0x100] sm:$0xff]  ;;  %v155_v47 = vld [vmem:[#allocation2 + $0x330] sm:$0xff] }
  0x32   :  { %399 = vmatpush.msrb.mxu3 %v200_v10  ;;  %378 = vmatpush.msrb.mxu1 %v125_v13  ;;  %v91_v48 = vld [vmem:[#allocation2 + $0x130] sm:$0xff]  ;;  %v201_v49 = vld [vmem:[#allocation2 + $0x4a0] sm:$0xff]  ;;  %v80_v50 = vld [vmem:[#allocation2 + $0xd8] sm:$0xff] }
  0x33   :  { %352 = vmatpush.msrb.mxu2 %v134_v12  ;;  %370 = vmatpush.msrb.mxu0 %v224_v15  ;;  %v150_v51 = vld [vmem:[#allocation2 + $0x308] sm:$0xff]  ;;  %v196_v53 = vld [vmem:[#allocation2 + $0x478] sm:$0xff]  ;;  %v75_v54 = vld [vmem:[#allocation2 + $0xb0] sm:$0xff] }
  0x34   :  { %400 = vmatpush.msrb.mxu3 %v195_v14  ;;  %379 = vmatpush.msrb.mxu1 %v120_v17  ;;  %v86_v52 = vld [vmem:[#allocation2 + $0x108] sm:$0xff]  ;;  %v145_v55 = vld [vmem:[#allocation2 + $0x2e0] sm:$0xff]  ;;  %v191_v57 = vld [vmem:[#allocation2 + $0x450] sm:$0xff] }
  0x35   :  { %333 = vmatmul.f32.vlgmr.msra.gmra.mxu3 %v1222_v2  ;;  %437 = vmatpush.msra.mxu2 %v131_v16  ;;  %v81_v56 = vld [vmem:[#allocation2 + $0xe0] sm:$0xff]  ;;  %v70_v58 = vld [vmem:[#allocation2 + $0x88] sm:$0xff]  ;;  %v140_v59 = vld [vmem:[#allocation2 + $0x2b8] sm:$0xff] }
  0x36   :  { %401 = vmatpush.msrb.mxu3 %v190_v18  ;;  %273 = vmatmul.f32.vlgmr.msra.gmra.mxu0 %v1222_v2  ;;  %v76_v60 = vld [vmem:[#allocation2 + $0xb8] sm:$0xff]  ;;  %v186_v61 = vld [vmem:[#allocation2 + $0x428] sm:$0xff]  ;;  %v65_v62 = vld [vmem:[#allocation2 + $0x60] sm:$0xff] }
  0x37   :  { %353 = vmatmul.f32.vlgmr.msrb.gmra.mxu2 %v1224_v3  ;;  %371 = vmatpush.msrb.mxu0 %v219_v19  ;;  %v135_v63 = vld [vmem:[#allocation2 + $0x290] sm:$0xff]  ;;  %v181_v4 = vld [vmem:[#allocation2 + $0x400] sm:$0xff]  ;;  %v132_v5 = vld [vmem:[#allocation2 + $0x278] sm:$0xff] }
  0x38   :  { %438 = vmatpush.msra.mxu2 %v126_v20  ;;  %380 = vmatpush.msrb.mxu1 %v115_v21  ;;  %v71_v1 = vld [vmem:[#allocation2 + $0x90] sm:$0xff]  ;;  %v60_v6 = vld [vmem:[#allocation2 + $0x38] sm:$0xff]  ;;  %v66_v7 = vld [vmem:[#allocation2 + $0x68] sm:$0xff] }
  0x39   :  { %402 = vmatpush.msrb.mxu3 %v185_v22  ;;  %372 = vmatpush.msrb.mxu0 %v214_v23  ;;  %v176_v8 = vld [vmem:[#allocation2 + $0x3d8] sm:$0xff]  ;;  %v127_v9 = vld [vmem:[#allocation2 + $0x250] sm:$0xff]  ;;  %v61_v11 = vld [vmem:[#allocation2 + $0x40] sm:$0xff] }
  0x3a   :  { %439 = vmatpush.msra.mxu2 %v121_v24  ;;  %381 = vmatpush.msrb.mxu1 %v110_v25  ;;  %v55_v10 = vld [vmem:[#allocation2 + $0x10] sm:$0xff]  ;;  %v122_v13 = vld [vmem:[#allocation2 + $0x228] sm:$0xff]  ;;  %v56_v14 = vld [vmem:[#allocation2 + $0x18] sm:$0xff] }
  0x3b   :  { %403 = vmatpush.msrb.mxu3 %v180_v26  ;;  %429 = vmatpush.msra.mxu0 %v230_v27  ;;  %v171_v12 = vld [vmem:[#allocation2 + $0x3b0] sm:$0xff]  ;;  %v166_v15 = vld [vmem:[#allocation2 + $0x388] sm:$0xff]  ;;  %v117_v16 = vld [vmem:[#allocation2 + $0x200] sm:$0xff] }
  0x3c   :  { %440 = vmatpush.msra.mxu2 %v116_v28  ;;  %382 = vmatpush.msrb.mxu1 %v105_v29  ;;  %v212_v17 = vld [vmem:[#allocation2 + $0x4f8] sm:$0xff]  ;;  %v161_v18 = vld [vmem:[#allocation2 + $0x360] sm:$0xff]  ;;  %v231_v19 = vld [vmem:[#allocation2 + $0x590] sm:$0xff] }
  0x3d   :  { %404 = vmatpush.msrb.mxu3 %v175_v30  ;;  %430 = vmatpush.msra.mxu0 %v225_v31  ;;  %v112_v20 = vld [vmem:[#allocation2 + $0x1d8] sm:$0xff]  ;;  %v207_v21 = vld [vmem:[#allocation2 + $0x4d0] sm:$0xff]  ;;  %v226_v23 = vld [vmem:[#allocation2 + $0x568] sm:$0xff] }
  0x3e   :  { %441 = vmatpush.msra.mxu2 %v111_v32  ;;  %383 = vmatpush.msrb.mxu1 %v100_v33  ;;  %v156_v22 = vld [vmem:[#allocation2 + $0x338] sm:$0xff]  ;;  %v107_v24 = vld [vmem:[#allocation2 + $0x1b0] sm:$0xff]  ;;  %v202_v25 = vld [vmem:[#allocation2 + $0x4a8] sm:$0xff] }
  0x3f   :  { %405 = vmatpush.msrb.mxu3 %v170_v34  ;;  %431 = vmatpush.msra.mxu0 %v220_v35  ;;  %v151_v26 = vld [vmem:[#allocation2 + $0x310] sm:$0xff]  ;;  %v221_v27 = vld [vmem:[#allocation2 + $0x540] sm:$0xff]  ;;  %v102_v28 = vld [vmem:[#allocation2 + $0x188] sm:$0xff] }
  0x40   :  { %442 = vmatpush.msra.mxu2 %v106_v36  ;;  %1101 = vmatmul.msk.f32.vlgmr.msrb.gmra.mxu0 %vm254_vm0, %v1220_v0  ;;  %v197_v29 = vld [vmem:[#allocation2 + $0x480] sm:$0xff]  ;;  %v146_v30 = vld [vmem:[#allocation2 + $0x2e8] sm:$0xff]  ;;  %v216_v31 = vld [vmem:[#allocation2 + $0x518] sm:$0xff] }
  0x41   :  { %384 = vmatpush.msrb.mxu1 %v95_v37  ;;  %406 = vmatpush.msrb.mxu3 %v165_v38  ;;  %v97_v32 = vld [vmem:[#allocation2 + $0x160] sm:$0xff]  ;;  %v192_v34 = vld [vmem:[#allocation2 + $0x458] sm:$0xff]  ;;  %v187_v38 = vld [vmem:[#allocation2 + $0x430] sm:$0xff] }
  0x42   :  { %432 = vmatpush.msra.mxu0 %v215_v39  ;;  %443 = vmatpush.msra.mxu2 %v101_v40  ;;  %v141_v33 = vld [vmem:[#allocation2 + $0x2c0] sm:$0xff]  ;;  %v92_v35 = vld [vmem:[#allocation2 + $0x138] sm:$0xff]  ;;  %v87_v39 = vld [vmem:[#allocation2 + $0x110] sm:$0xff] }
  0x43   :  { %385 = vmatpush.msrb.mxu1 %v90_v42  ;;  %407 = vmatpush.msrb.mxu3 %v160_v43  ;;  %v232_v36 = vld [vmem:[#allocation2 + $0x598] sm:$0xff]  ;;  %v182_v40 = vld [vmem:[#allocation2 + $0x408] sm:$0xff]  ;;  %v177_v43 = vld [vmem:[#allocation2 + $0x3e0] sm:$0xff] }
  0x44   :  { %457 = vmatpush.msrb.mxu0 %v211_v41  ;;  %444 = vmatpush.msra.mxu2 %v96_v44  ;;  %v136_v37 = vld [vmem:[#allocation2 + $0x298] sm:$0xff]  ;;  %v227_v41 = vld [vmem:[#allocation2 + $0x570] sm:$0xff]  ;;  %v82_v42 = vld [vmem:[#allocation2 + $0xe8] sm:$0xff] }
  0x45   :  { %386 = vmatpush.msrb.mxu1 %v85_v46  ;;  %408 = vmatpush.msrb.mxu3 %v155_v47  ;;  %v222_v44 = vld [vmem:[#allocation2 + $0x548] sm:$0xff]  ;;  %v172_v46 = vld [vmem:[#allocation2 + $0x3b8] sm:$0xff]  ;;  %v217_v47 = vld [vmem:[#allocation2 + $0x520] sm:$0xff] }
  0x46   :  { %458 = vmatpush.msrb.mxu0 %v206_v45  ;;  %293 = vmatmul.f32.vlgmr.msra.gmra.mxu1 %v1224_v3  ;;  %v77_v45 = vld [vmem:[#allocation2 + $0xc0] sm:$0xff] }
  0x47   :  { %445 = vmatpush.msra.mxu2 %v91_v48  ;;  %387 = vmatpush.msrb.mxu1 %v80_v50  ;;  %v72_v48 = vld [vmem:[#allocation2 + $0x98] sm:$0xff]  ;;  %v624_v50 = vld [vmem:[#allocation4 + $0x1f0] sm:$0xff] }
  0x48   :  { %459 = vmatpush.msrb.mxu0 %v201_v49  ;;  %409 = vmatpush.msrb.mxu3 %v150_v51  ;;  %v167_v49 = vld [vmem:[#allocation2 + $0x390] sm:$0xff] }
  0x49   :  { %446 = vmatpush.msra.mxu2 %v86_v52  ;;  %388 = vmatpush.msrb.mxu1 %v75_v54  ;;  %v67_v51 = vld [vmem:[#allocation2 + $0x70] sm:$0xff]  ;;  %v162_v52 = vld [vmem:[#allocation2 + $0x368] sm:$0xff] }
  0x4a   :  { %460 = vmatpush.msrb.mxu0 %v196_v53  ;;  %410 = vmatpush.msrb.mxu3 %v145_v55  ;;  %v622_v53 = vld [vmem:[#allocation4 + $0x1e0] sm:$0xff]  ;;  %v592_v54 = vld [vmem:[#allocation4 + $0xf0] sm:$0xff]  ;;  %v62_v55 = vld [vmem:[#allocation2 + $0x48] sm:$0xff] }
  0x4b   :  { %447 = vmatpush.msra.mxu2 %v81_v56  ;;  %389 = vmatpush.msrb.mxu1 %v70_v58  ;;  %v590_v56 = vld [vmem:[#allocation4 + $0xe0] sm:$0xff]  ;;  %v620_v58 = vld [vmem:[#allocation4 + $0x1d0] sm:$0xff] }
  0x4c   :  { %461 = vmatpush.msrb.mxu0 %v191_v57  ;;  %411 = vmatpush.msrb.mxu3 %v140_v59  ;;  %v157_v57 = vld [vmem:[#allocation2 + $0x340] sm:$0xff] }
  0x4d   :  { %448 = vmatpush.msra.mxu2 %v76_v60  ;;  %390 = vmatpush.msrb.mxu1 %v65_v62  ;;  %v57_v59 = vld [vmem:[#allocation2 + $0x20] sm:$0xff]  ;;  %v588_v60 = vld [vmem:[#allocation4 + $0xd0] sm:$0xff] }
  0x4e   :  { %462 = vmatpush.msrb.mxu0 %v186_v61  ;;  %412 = vmatpush.msrb.mxu3 %v135_v63  ;;  %v152_v61 = vld [vmem:[#allocation2 + $0x318] sm:$0xff]  ;;  %v586_v62 = vld [vmem:[#allocation4 + $0xc0] sm:$0xff]  ;;  %v147_v63 = vld [vmem:[#allocation2 + $0x2f0] sm:$0xff] }
  0x4f   :  { %449 = vmatpush.msra.mxu2 %v71_v1  ;;  %413 = vmatmul.f32.vlgmr.msrb.gmra.mxu3 %v1224_v3  ;;  %v656_v1 = vld [vmem:[#allocation4 + $0x2f0] sm:$0xff] }
  0x50   :  { %463 = vmatpush.msrb.mxu0 %v181_v4  ;;  %497 = vmatpush.msra.mxu3 %v132_v5  ;;  %v616_v4 = vld [vmem:[#allocation4 + $0x1b0] sm:$0xff]  ;;  %v142_v5 = vld [vmem:[#allocation2 + $0x2c8] sm:$0xff] }
  0x51   :  { %391 = vmatpush.msrb.mxu1 %v60_v6  ;;  %450 = vmatpush.msra.mxu2 %v66_v7  ;;  %v614_v6 = vld [vmem:[#allocation4 + $0x1a0] sm:$0xff] }
  0x52   :  { %464 = vmatpush.msrb.mxu0 %v176_v8  ;;  %498 = vmatpush.msra.mxu3 %v127_v9  ;;  %v137_v7 = vld [vmem:[#allocation2 + $0x2a0] sm:$0xff]  ;;  %v612_v8 = vld [vmem:[#allocation4 + $0x190] sm:$0xff] }
  0x53   :  { %392 = vmatpush.msrb.mxu1 %v55_v10  ;;  %451 = vmatpush.msra.mxu2 %v61_v11  ;;  %v688_v9 = vld [vmem:[#allocation4 + $0x3f0] sm:$0xff]  ;;  %v610_v10 = vld [vmem:[#allocation4 + $0x180] sm:$0xff] }
  0x54   :  { %393 = vmatmul.f32.vlgmr.msrb.gmra.mxu1 %v1222_v2  ;;  %465 = vmatpush.msrb.mxu0 %v171_v12  ;;  %v608_v11 = vld [vmem:[#allocation4 + $0x170] sm:$0xff]  ;;  %v606_v12 = vld [vmem:[#allocation4 + $0x160] sm:$0xff] }
  0x55   :  { %499 = vmatpush.msra.mxu3 %v122_v13  ;;  %452 = vmatpush.msra.mxu2 %v56_v14  ;;  %v604_v13 = vld [vmem:[#allocation4 + $0x150] sm:$0xff]  ;;  %v602_v14 = vld [vmem:[#allocation4 + $0x140] sm:$0xff] }
  0x56   :  { %1102 = vmatmul.msk.f32.vlgmr.msra.gmra.mxu0 %vm254_vm0, %v1220_v0  ;;  %453 = vmatmul.f32.vlgmr.msra.gmra.mxu2 %v1222_v2 }
  0x57   :  { %466 = vmatpush.msrb.mxu0 %v166_v15  ;;  %500 = vmatpush.msra.mxu3 %v117_v16  ;;  %v600_v15 = vld [vmem:[#allocation4 + $0x130] sm:$0xff]  ;;  %v598_v16 = vld [vmem:[#allocation4 + $0x120] sm:$0xff] }
  0x58   :  { %517 = vmatpush.msra.mxu1 %v212_v17  ;;  %489 = vmatpush.msrb.mxu2 %v231_v19  ;;  %v596_v17 = vld [vmem:[#allocation4 + $0x110] sm:$0xff]  ;;  %v591_v19 = vld [vmem:[#allocation4 + $0xe8] sm:$0xff] }
  0x59   :  { %467 = vmatpush.msrb.mxu0 %v161_v18  ;;  %501 = vmatpush.msra.mxu3 %v112_v20  ;;  %v594_v18 = vld [vmem:[#allocation4 + $0x100] sm:$0xff]  ;;  %v589_v20 = vld [vmem:[#allocation4 + $0xd8] sm:$0xff] }
  0x5a   :  { %518 = vmatpush.msra.mxu1 %v207_v21  ;;  %490 = vmatpush.msrb.mxu2 %v226_v23  ;;  %v587_v21 = vld [vmem:[#allocation4 + $0xc8] sm:$0xff]  ;;  %v654_v23 = vld [vmem:[#allocation4 + $0x2e0] sm:$0xff] }
  0x5b   :  { %468 = vmatpush.msrb.mxu0 %v156_v22  ;;  %502 = vmatpush.msra.mxu3 %v107_v24  ;;  %v584_v22 = vld [vmem:[#allocation4 + $0xb0] sm:$0xff] }
  0x5c   :  { %519 = vmatpush.msra.mxu1 %v202_v25  ;;  %491 = vmatpush.msrb.mxu2 %v221_v27  ;;  %v684_v24 = vld [vmem:[#allocation4 + $0x3d0] sm:$0xff]  ;;  %v585_v25 = vld [vmem:[#allocation4 + $0xb8] sm:$0xff] }
  0x5d   :  { %469 = vmatpush.msrb.mxu0 %v151_v26  ;;  %503 = vmatpush.msra.mxu3 %v102_v28  ;;  %v582_v26 = vld [vmem:[#allocation4 + $0xa0] sm:$0xff]  ;;  %v652_v27 = vld [vmem:[#allocation4 + $0x2d0] sm:$0xff] }
  0x5e   :  { %520 = vmatpush.msra.mxu1 %v197_v29  ;;  %492 = vmatpush.msrb.mxu2 %v216_v31  ;;  %v682_v28 = vld [vmem:[#allocation4 + $0x3c0] sm:$0xff]  ;;  %v583_v29 = vld [vmem:[#allocation4 + $0xa8] sm:$0xff] }
  0x5f   :  { %470 = vmatpush.msrb.mxu0 %v146_v30  ;;  %504 = vmatpush.msra.mxu3 %v97_v32  ;;  %v580_v30 = vld [vmem:[#allocation4 + $0x90] sm:$0xff]  ;;  %v650_v31 = vld [vmem:[#allocation4 + $0x2c0] sm:$0xff] }
  0x60   :  { %1103 = vmatmul.msk.f32.vlgmr.msrb.gmra.mxu2 %vm254_vm0, %v1220_v0  ;;  %521 = vmatpush.msra.mxu1 %v192_v34  ;;  %v680_v32 = vld [vmem:[#allocation4 + $0x3b0] sm:$0xff]  ;;  %v578_v34 = vld [vmem:[#allocation4 + $0x80] sm:$0xff] }
  0x61   :  { %471 = vmatpush.msrb.mxu0 %v141_v33  ;;  %505 = vmatpush.msra.mxu3 %v92_v35  ;;  %v581_v33 = vld [vmem:[#allocation4 + $0x98] sm:$0xff]  ;;  %v648_v35 = vld [vmem:[#allocation4 + $0x2b0] sm:$0xff] }
  0x62   :  { %549 = vmatpush.msra.mxu2 %v232_v36  ;;  %522 = vmatpush.msra.mxu1 %v187_v38  ;;  %v678_v36 = vld [vmem:[#allocation4 + $0x3a0] sm:$0xff]  ;;  %v576_v38 = vld [vmem:[#allocation4 + $0x70] sm:$0xff] }
  0x63   :  { %472 = vmatpush.msrb.mxu0 %v136_v37  ;;  %506 = vmatpush.msra.mxu3 %v87_v39  ;;  %v579_v37 = vld [vmem:[#allocation4 + $0x88] sm:$0xff]  ;;  %v646_v39 = vld [vmem:[#allocation4 + $0x2a0] sm:$0xff] }
  0x64   :  { %473 = vmatmul.f32.vlgmr.msrb.gmra.mxu0 %v1224_v3  ;;  %523 = vmatpush.msra.mxu1 %v182_v40  ;;  %v676_v40 = vld [vmem:[#allocation4 + $0x390] sm:$0xff] }
  0x65   :  { %550 = vmatpush.msra.mxu2 %v227_v41  ;;  %507 = vmatpush.msra.mxu3 %v82_v42  ;;  %v577_v41 = vld [vmem:[#allocation4 + $0x78] sm:$0xff]  ;;  %v574_v42 = vld [vmem:[#allocation4 + $0x60] sm:$0xff] }
  0x66   :  { %524 = vmatpush.msra.mxu1 %v177_v43  ;;  %708 = vmatpush.msra.mxu0 %v592_v54  ;;  %v644_v43 = vld [vmem:[#allocation4 + $0x290] sm:$0xff] }
  0x67   :  { %551 = vmatpush.msra.mxu2 %v222_v44  ;;  %508 = vmatpush.msra.mxu3 %v77_v45  ;;  %v674_v44 = vld [vmem:[#allocation4 + $0x380] sm:$0xff]  ;;  %v575_v45 = vld [vmem:[#allocation4 + $0x68] sm:$0xff]  ;;  %v568_v54 = vld [vmem:[#allocation4 + $0x30] sm:$0xff] }
  0x68   :  { %525 = vmatpush.msra.mxu1 %v172_v46  ;;  %709 = vmatpush.msra.mxu0 %v590_v56  ;;  %v572_v46 = vld [vmem:[#allocation4 + $0x50] sm:$0xff] }
  0x69   :  { %552 = vmatpush.msra.mxu2 %v217_v47  ;;  %509 = vmatpush.msra.mxu3 %v72_v48  ;;  %v642_v47 = vld [vmem:[#allocation4 + $0x280] sm:$0xff]  ;;  %v672_v48 = vld [vmem:[#allocation4 + $0x370] sm:$0xff] }
  0x6a   :  { %1104 = vmatmul.msk.f32.vlgmr.msra.gmra.mxu2 %vm254_vm0, %v1220_v0  ;;  %526 = vmatpush.msra.mxu1 %v167_v49  ;;  %v618_v0 = vld [vmem:[#allocation4 + $0x1c0] sm:$0xff]  ;;  %v573_v49 = vld [vmem:[#allocation4 + $0x58] sm:$0xff]  ;;  %v668_v56 = vld [vmem:[#allocation4 + $0x350] sm:$0xff] }
  0x6b   :  { %728 = vmatpush.msrb.mxu2 %v624_v50  ;;  %510 = vmatpush.msra.mxu3 %v67_v51  ;;  %v570_v50 = vld [vmem:[#allocation4 + $0x40] sm:$0xff]  ;;  %v640_v51 = vld [vmem:[#allocation4 + $0x270] sm:$0xff] }
  0x6c   :  { %527 = vmatpush.msra.mxu1 %v162_v52  ;;  %710 = vmatpush.msra.mxu0 %v588_v60  ;;  %v670_v52 = vld [vmem:[#allocation4 + $0x360] sm:$0xff] }
  0x6d   :  { %729 = vmatpush.msrb.mxu2 %v622_v53  ;;  %511 = vmatpush.msra.mxu3 %v62_v55  ;;  %v571_v53 = vld [vmem:[#allocation4 + $0x48] sm:$0xff]  ;;  %v638_v55 = vld [vmem:[#allocation4 + $0x260] sm:$0xff] }
  0x6e   :  { %528 = vmatpush.msra.mxu1 %v157_v57  ;;  %711 = vmatpush.msra.mxu0 %v586_v62  ;;  %v569_v57 = vld [vmem:[#allocation4 + $0x38] sm:$0xff]  ;;  %v666_v60 = vld [vmem:[#allocation4 + $0x340] sm:$0xff] }
  0x6f   :  { %730 = vmatpush.msrb.mxu2 %v620_v58  ;;  %512 = vmatpush.msra.mxu3 %v57_v59  ;;  %v566_v58 = vld [vmem:[#allocation4 + $0x20] sm:$0xff]  ;;  %v636_v59 = vld [vmem:[#allocation4 + $0x250] sm:$0xff] }
  0x70   :  { %513 = vmatmul.f32.vlgmr.msra.gmra.mxu3 %v1222_v2  ;;  %529 = vmatpush.msra.mxu1 %v152_v61  ;;  %v686_v2 = vld [vmem:[#allocation4 + $0x3e0] sm:$0xff]  ;;  %v567_v61 = vld [vmem:[#allocation4 + $0x28] sm:$0xff] }
  0x71   :  { %731 = vmatpush.msrb.mxu2 %v618_v0  ;;  %748 = vmatpush.msrb.mxu3 %v656_v1  ;;  %v564_v0 = vld [vmem:[#allocation4 + $0x10] sm:$0xff]  ;;  %v634_v62 = vld [vmem:[#allocation4 + $0x240] sm:$0xff]  ;;  %v565_v1 = vld [vmem:[#allocation4 + $0x18] sm:$0xff] }
  0x72   :  { %530 = vmatpush.msra.mxu1 %v147_v63  ;;  %712 = vmatpush.msra.mxu0 %v584_v22  ;;  %v664_v63 = vld [vmem:[#allocation4 + $0x330] sm:$0xff]  ;;  %v653_v22 = vld [vmem:[#allocation4 + $0x2d8] sm:$0xff] }
  0x73   :  { %732 = vmatpush.msrb.mxu2 %v616_v4  ;;  %749 = vmatpush.msrb.mxu3 %v654_v23  ;;  %v562_v4 = vld [vmem:[#allocation4] sm:$0xff]  ;;  %v683_v23 = vld [vmem:[#allocation4 + $0x3c8] sm:$0xff] }
  0x74   :  { %531 = vmatpush.msra.mxu1 %v142_v5  ;;  %713 = vmatpush.msra.mxu0 %v582_v26  ;;  %v632_v5 = vld [vmem:[#allocation4 + $0x230] sm:$0xff]  ;;  %v681_v26 = vld [vmem:[#allocation4 + $0x3b8] sm:$0xff] }
  0x75   :  { %733 = vmatpush.msrb.mxu2 %v614_v6  ;;  %750 = vmatpush.msrb.mxu3 %v652_v27  ;;  %v662_v6 = vld [vmem:[#allocation4 + $0x320] sm:$0xff] }
  0x76   :  { %532 = vmatpush.msra.mxu1 %v137_v7  ;;  %714 = vmatpush.msra.mxu0 %v580_v30  ;;  %v563_v7 = vld [vmem:[#allocation4 + $0x8] sm:$0xff]  ;;  %v649_v30 = vld [vmem:[#allocation4 + $0x2b8] sm:$0xff] }
  0x77   :  { %533 = vmatmul.f32.vlgmr.msra.gmra.mxu1 %v1224_v3  ;;  %734 = vmatpush.msrb.mxu2 %v612_v8  ;;  %v593_v3 = vld [vmem:[#allocation4 + $0xf8] sm:$0xff]  ;;  %v630_v8 = vld [vmem:[#allocation4 + $0x220] sm:$0xff] }
  0x78   :  { %768 = vmatpush.msrb.mxu1 %v688_v9  ;;  %751 = vmatpush.msrb.mxu3 %v650_v31  ;;  %v233_v9 = vld [vmem:[%s1443_s4] ss:$8 sm:$0xf] }
  0x79   :  { %735 = vmatpush.msrb.mxu2 %v610_v10  ;;  %715 = vmatpush.msra.mxu0 %v578_v34  ;;  %v660_v10 = vld [vmem:[#allocation4 + $0x310] sm:$0xff]  ;;  %v679_v31 = vld [vmem:[#allocation4 + $0x3a8] sm:$0xff] }
  0x7a   :  { %769 = vmatpush.msrb.mxu1 %v686_v2  ;;  %752 = vmatpush.msrb.mxu3 %v648_v35  ;;  %v234_v2 = vld [vmem:[%s1443_s4] ss:$8 sm:$0x10]  ;;  %v696_v34 = vld [vmem:[#allocation4 + $0x430] sm:$0xff] }
  0x7b   :  { %736 = vmatpush.msrb.mxu2 %v608_v11  ;;  %716 = vmatpush.msra.mxu0 %v576_v38  ;;  %v628_v11 = vld [vmem:[#allocation4 + $0x210] sm:$0xff] }
  0x7c   :  { %770 = vmatpush.msrb.mxu1 %v684_v24  ;;  %753 = vmatpush.msrb.mxu3 %v646_v39  ;;  %v675_v39 = vld [vmem:[#allocation4 + $0x388] sm:$0xff] }
  0x7d   :  { %737 = vmatpush.msrb.mxu2 %v606_v12  ;;  %717 = vmatpush.msra.mxu0 %v574_v42  ;;  %v658_v12 = vld [vmem:[#allocation4 + $0x300] sm:$0xff] }
  0x7e   :  { %771 = vmatpush.msrb.mxu1 %v682_v28  ;;  %754 = vmatpush.msrb.mxu3 %v644_v43  ;;  %v643_v43 = vld [vmem:[#allocation4 + $0x288] sm:$0xff] }
  0x7f   :  { %738 = vmatpush.msrb.mxu2 %v604_v13  ;;  %718 = vmatpush.msra.mxu0 %v572_v46  ;;  %v689_v13 = vld [vmem:[#allocation4 + $0x3f8] sm:$0xff] }
  0x80   :  { %772 = vmatpush.msrb.mxu1 %v680_v32  ;;  %755 = vmatpush.msrb.mxu3 %v642_v47  ;;  %v647_v32 = vld [vmem:[#allocation4 + $0x2a8] sm:$0xff]  ;;  %v641_v46 = vld [vmem:[#allocation4 + $0x278] sm:$0xff] }
  0x81   :  { %739 = vmatpush.msrb.mxu2 %v602_v14  ;;  %719 = vmatpush.msra.mxu0 %v570_v50  ;;  %v671_v47 = vld [vmem:[#allocation4 + $0x368] sm:$0xff] }
  0x82   :  { %773 = vmatpush.msrb.mxu1 %v678_v36  ;;  %756 = vmatpush.msrb.mxu3 %v640_v51  ;;  %v645_v36 = vld [vmem:[#allocation4 + $0x298] sm:$0xff]  ;;  %v639_v51 = vld [vmem:[#allocation4 + $0x268] sm:$0xff] }
  0x83   :  { %740 = vmatpush.msrb.mxu2 %v600_v15  ;;  %720 = vmatpush.msra.mxu0 %v568_v54  ;;  %v1254_v15 = vor.u32 %v234_v2, %v233_v9  ;;  %v667_v54 = vld [vmem:[#allocation4 + $0x348] sm:$0xff] }
  0x84   :  { %774 = vmatpush.msrb.mxu1 %v676_v40  ;;  %757 = vmatpush.msrb.mxu3 %v638_v55 }
  0x85   :  { %741 = vmatpush.msrb.mxu2 %v598_v16  ;;  %721 = vmatpush.msra.mxu0 %v566_v58  ;;  %v626_v16 = vld [vmem:[#allocation4 + $0x200] sm:$0xff]  ;;  %v237_v35 = vperm.slane %v1254_v15, 0  ;;  %v625_v58 = vld [vmem:[#allocation4 + $0x1f8] sm:$0xff] }
  0x86   :  { %775 = vmatpush.msrb.mxu1 %v674_v44  ;;  %758 = vmatpush.msrb.mxu3 %v636_v59  ;;  %v673_v44 = vld [vmem:[#allocation4 + $0x378] sm:$0xff] }
  0x87   :  { %742 = vmatpush.msrb.mxu2 %v596_v17  ;;  %722 = vmatpush.msra.mxu0 %v564_v0  ;;  %v657_v17 = vld [vmem:[#allocation4 + $0x2f8] sm:$0xff]  ;;  %v663_v0 = vld [vmem:[#allocation4 + $0x328] sm:$0xff] }
  0x88   :  { %776 = vmatpush.msrb.mxu1 %v672_v48  ;;  %759 = vmatpush.msrb.mxu3 %v634_v62  ;;  %v665_v59 = vld [vmem:[#allocation4 + $0x338] sm:$0xff]  ;;  %v631_v62 = vld [vmem:[#allocation4 + $0x228] sm:$0xff] }
  0x89   :  { %743 = vmatpush.msrb.mxu2 %v594_v18  ;;  %723 = vmatpush.msra.mxu0 %v562_v4  ;;  %v687_v18 = vld [vmem:[#allocation4 + $0x3e8] sm:$0xff]  ;;  %v239_v4 = vperm.slane %v1254_v15, 2 }
  0x8a   :  { %777 = vmatpush.msrb.mxu1 %v670_v52  ;;  %760 = vmatpush.msrb.mxu3 %v632_v5  ;;  %v669_v52 = vld [vmem:[#allocation4 + $0x358] sm:$0xff] }
  0x8b   :  { %808 = vmatpush.msra.mxu2 %v593_v3  ;;  %800 = vmatpush.msrb.mxu0 %v696_v34  ;;  %v629_v5 = vld [vmem:[#allocation4 + $0x218] sm:$0xff]  ;;  %v599_v34 = vld [vmem:[#allocation4 + $0x128] sm:$0xff] }
  0x8c   :  { %778 = vmatpush.msrb.mxu1 %v668_v56  ;;  %761 = vmatpush.msrb.mxu3 %v630_v8  ;;  %v635_v56 = vld [vmem:[#allocation4 + $0x248] sm:$0xff] }
  0x8d   :  { %809 = vmatpush.msra.mxu2 %v591_v19  ;;  %v655_v19 = vld [vmem:[#allocation4 + $0x2e8] sm:$0xff] }
  0x8e   :  { %779 = vmatpush.msrb.mxu1 %v666_v60  ;;  %762 = vmatpush.msrb.mxu3 %v628_v11  ;;  %v633_v60 = vld [vmem:[#allocation4 + $0x238] sm:$0xff]  ;;  %v627_v8 = vld [vmem:[#allocation4 + $0x208] sm:$0xff] }
  0x8f   :  { %810 = vmatpush.msra.mxu2 %v589_v20  ;;  %v685_v20 = vld [vmem:[#allocation4 + $0x3d8] sm:$0xff] }
  0x90   :  { %780 = vmatpush.msrb.mxu1 %v664_v63  ;;  %763 = vmatpush.msrb.mxu3 %v626_v16  ;;  %v621_v63 = vld [vmem:[#allocation4 + $0x1d8] sm:$0xff] }
  0x91   :  { %811 = vmatpush.msra.mxu2 %v587_v21  ;;  %v238_v21 = vperm.slane %v1254_v15, 1  ;;  %v613_v16 = vld [vmem:[#allocation4 + $0x198] sm:$0xff] }
  0x92   :  { %781 = vmatpush.msrb.mxu1 %v662_v6  ;;  %848 = vmatpush.msra.mxu3 %v657_v17  ;;  %v619_v6 = vld [vmem:[#allocation4 + $0x1c8] sm:$0xff]  ;;  %v697_v17 = vld [vmem:[#allocation4 + $0x438] sm:$0xff] }
  0x93   :  { %812 = vmatpush.msra.mxu2 %v585_v25  ;;  %v651_v25 = vld [vmem:[#allocation4 + $0x2c8] sm:$0xff] }
  0x94   :  { %782 = vmatpush.msrb.mxu1 %v660_v10  ;;  %849 = vmatpush.msra.mxu3 %v655_v19  ;;  %v617_v10 = vld [vmem:[#allocation4 + $0x1b8] sm:$0xff]  ;;  %v695_v19 = vld [vmem:[#allocation4 + $0x428] sm:$0xff] }
  0x95   :  { %813 = vmatpush.msra.mxu2 %v583_v29 }
  0x96   :  { %783 = vmatpush.msrb.mxu1 %v658_v12  ;;  %850 = vmatpush.msra.mxu3 %v653_v22  ;;  %v693_v22 = vld [vmem:[#allocation4 + $0x418] sm:$0xff] }
  0x97   :  { %814 = vmatpush.msra.mxu2 %v581_v33  ;;  %v677_v33 = vld [vmem:[#allocation4 + $0x398] sm:$0xff] }
  0x98   :  { %868 = vmatpush.msra.mxu1 %v689_v13  ;;  %851 = vmatpush.msra.mxu3 %v651_v25  ;;  %v615_v13 = vld [vmem:[#allocation4 + $0x1a8] sm:$0xff] }
  0x99   :  { %815 = vmatpush.msra.mxu2 %v579_v37  ;;  %v694_v37 = vld [vmem:[#allocation4 + $0x420] sm:$0xff]  ;;  %v607_v25 = vld [vmem:[#allocation4 + $0x168] sm:$0xff] }
  0x9a   :  { %869 = vmatpush.msra.mxu1 %v687_v18  ;;  %852 = vmatpush.msra.mxu3 %v649_v30 }
  0x9b   :  { %816 = vmatpush.msra.mxu2 %v577_v41  ;;  %801 = vmatpush.msrb.mxu0 %v694_v37 }
  0x9c   :  { %870 = vmatpush.msra.mxu1 %v685_v20  ;;  %853 = vmatpush.msra.mxu3 %v647_v32 }
  0x9d   :  { %817 = vmatpush.msra.mxu2 %v575_v45  ;;  %v692_v45 = vld [vmem:[#allocation4 + $0x410] sm:$0xff] }
  0x9e   :  { %871 = vmatpush.msra.mxu1 %v683_v23  ;;  %854 = vmatpush.msra.mxu3 %v645_v36  ;;  %v240_v23 = vperm.slane %v1254_v15, 3  ;;  %v597_v36 = vld [vmem:[#allocation4 + $0x118] sm:$0xff] }
  0x9f   :  { %818 = vmatpush.msra.mxu2 %v573_v49  ;;  %802 = vmatpush.msrb.mxu0 %v692_v45  ;;  %v690_v49 = vld [vmem:[#allocation4 + $0x400] sm:$0xff] }
  0xa0   :  { %872 = vmatpush.msra.mxu1 %v681_v26  ;;  %855 = vmatpush.msra.mxu3 %v643_v43  ;;  %v691_v26 = vld [vmem:[#allocation4 + $0x408] sm:$0xff] }
  0xa1   :  { %819 = vmatpush.msra.mxu2 %v571_v53  ;;  %803 = vmatpush.msrb.mxu0 %v690_v49  ;;  %v637_v53 = vld [vmem:[#allocation4 + $0x258] sm:$0xff]  ;;  %v925_v49 = vld [vmem:[%s1442_s3 + $0x78] sm:$0xff] }
  0xa2   :  { %873 = vmatpush.msra.mxu1 %v679_v31  ;;  %856 = vmatpush.msra.mxu3 %v641_v46  ;;  %v601_v31 = vld [vmem:[#allocation4 + $0x138] sm:$0xff] }
  0xa3   :  { %820 = vmatpush.msra.mxu2 %v569_v57 }
  0xa4   :  { %874 = vmatpush.msra.mxu1 %v677_v33  ;;  %857 = vmatpush.msra.mxu3 %v639_v51  ;;  %v920_v51 = vld [vmem:[%s1442_s3 + $0x50] sm:$0xff] }
  0xa5   :  { %821 = vmatpush.msra.mxu2 %v567_v61  ;;  %v623_v61 = vld [vmem:[#allocation4 + $0x1e8] sm:$0xff] }
  0xa6   :  { %875 = vmatpush.msra.mxu1 %v675_v39  ;;  %858 = vmatpush.msra.mxu3 %v637_v53  ;;  %v241_v39 = vperm.slane %v1254_v15, 4  ;;  %v924_v15 = vld [vmem:[%s1442_s3 + $0x70] sm:$0xff]  ;;  %v918_v53 = vld [vmem:[%s1442_s3 + $0x40] sm:$0xff] }
  0xa7   :  { %822 = vmatpush.msra.mxu2 %v565_v1  ;;  %v661_v1 = vld [vmem:[#allocation4 + $0x318] sm:$0xff] }
  0xa8   :  { %876 = vmatpush.msra.mxu1 %v673_v44  ;;  %859 = vmatpush.msra.mxu3 %v635_v56  ;;  %v938_v56 = vld [vmem:[%s1442_s3 + $0xe0] sm:$0xff] }
  0xa9   :  { %823 = vmatpush.msra.mxu2 %v563_v7  ;;  %v659_v7 = vld [vmem:[#allocation4 + $0x308] sm:$0xff] }
  0xaa   :  { %877 = vmatpush.msra.mxu1 %v671_v47  ;;  %860 = vmatpush.msra.mxu3 %v633_v60  ;;  %v936_v60 = vld [vmem:[%s1442_s3 + $0xd0] sm:$0xff] }
  0xac   :  { %878 = vmatpush.msra.mxu1 %v669_v52  ;;  %861 = vmatpush.msra.mxu3 %v631_v62  ;;  %v919_v52 = vld [vmem:[%s1442_s3 + $0x48] sm:$0xff]  ;;  %v912_v62 = vld [vmem:[%s1442_s3 + $0x10] sm:$0xff] }
  0xae   :  { %879 = vmatpush.msra.mxu1 %v667_v54  ;;  %862 = vmatpush.msra.mxu3 %v629_v5  ;;  %v917_v54 = vld [vmem:[%s1442_s3 + $0x38] sm:$0xff]  ;;  %v910_v5 = vld [vmem:[%s1442_s3] sm:$0xff] }
  0xaf   :  { %v1252_v14 = vpop.f32.mrf.mxu2 }
  0xb0   :  { %880 = vmatpush.msra.mxu1 %v665_v59  ;;  %863 = vmatpush.msra.mxu3 %v627_v8  ;;  %v915_v59 = vld [vmem:[%s1442_s3 + $0x28] sm:$0xff] }
  0xb1   :  { %v931_v8 = vld [vmem:[%s1442_s3 + $0xa8] sm:$0xff] }
  0xb2   :  { %881 = vmatpush.msra.mxu1 %v663_v0  ;;  %v913_v0 = vld [vmem:[%s1442_s3 + $0x18] sm:$0xff] }
  0xb3   :  { %v274_v3 = vpop.f32.mrf.mxu0 }
  0xb4   :  { %v275_v41 = vadd.f32 %v274_v3, %v237_v35  ;;  %882 = vmatpush.msra.mxu1 %v661_v1  ;;  %v611_v3 = vld [vmem:[#allocation4 + $0x188] sm:$0xff]  ;;  %v911_v1 = vld [vmem:[%s1442_s3 + $0x8] sm:$0xff] }
  0xb6   :  { %883 = vmatpush.msra.mxu1 %v659_v7  ;;  %v932_v7 = vld [vmem:[%s1442_s3 + $0xb0] sm:$0xff] }
  0xb8   :  { %v334_v24 = vpop.f32.mrf.mxu3 }
  0xb9   :  { %v335_v27 = vadd.f32 %v334_v24, %v238_v21  ;;  %v609_v21 = vld [vmem:[#allocation4 + $0x178] sm:$0xff] }
  0xba   :  { %v354_v28 = vpop.f32.mrf.mxu2 }
  0xbb   :  { %v355_v29 = vadd.f32 %v354_v28, %v335_v27  ;;  %v605_v27 = vld [vmem:[#allocation4 + $0x158] sm:$0xff] }
  0xbd   :  { %v374_v38 = vpop.f32.mrf.mxu0 }
  0xbe   :  { %v1258_v40 = vadd.f32 %v374_v38, %v355_v29  ;;  %v603_v29 = vld [vmem:[#allocation4 + $0x148] sm:$0xff] }
  0xbf   :  { %v595_v38 = vld [vmem:[#allocation4 + $0x108] sm:$0xff] }
  0xc0   :  { %v558_v42 = vmax.f32 %v1258_v40, 0.0  ;;  %v922_v40 = vld [vmem:[%s1442_s3 + $0x60] sm:$0xff] }
  0xc2   :  { %744 = vmatmul.f32.vlgmr.msrb.gmra.mxu2 %v558_v42 }
  0xc3   :  { %v294_v48 = vpop.f32.mrf.mxu1  ;;  %900 = vmatpush.msrb.mxu2 %v697_v17 }
  0xc4   :  { %v295_v50 = vadd.f32 %v294_v48, %v275_v41 }
  0xc5   :  { %901 = vmatpush.msrb.mxu2 %v695_v19 }
  0xc6   :  { %v315_v55 = vadd.f32 %v1252_v14, %v295_v50  ;;  %v923_v50 = vld [vmem:[%s1442_s3 + $0x68] sm:$0xff] }
  0xc7   :  { %902 = vmatpush.msrb.mxu2 %v693_v22 }
  0xc8   :  { %v557_v57 = vmax.f32 %v315_v55, 0.0  ;;  %v939_v55 = vld [vmem:[%s1442_s3 + $0xe8] sm:$0xff] }
  0xc9   :  { %903 = vmatpush.msrb.mxu2 %v691_v26 }
  0xca   :  { %724 = vmatmul.f32.vlgmr.msra.gmra.mxu0 %v557_v57  ;;  %824 = vmatmul.f32.vlgmr.msra.gmra.mxu2 %v557_v57  ;;  %v916_v57 = vld [vmem:[%s1442_s3 + $0x30] sm:$0xff] }
  0xcb   :  { %828 = vmatpush.msra.mxu0 %v625_v58  ;;  %967 = vmatpush.msra.mxu2 %v939_v55  ;;  %v937_v58 = vld [vmem:[%s1442_s3 + $0xd8] sm:$0xff] }
  0xcc   :  { %v1061_v55 = vld [vmem:[%s1442_s3 + $0x178] sm:$0xff] }
  0xcd   :  { %829 = vmatpush.msra.mxu0 %v623_v61  ;;  %968 = vmatpush.msra.mxu2 %v938_v56  ;;  %v914_v61 = vld [vmem:[%s1442_s3 + $0x20] sm:$0xff] }
  0xce   :  { %v940_v56 = vld [vmem:[%s1443_s4 + $0x2] ss:$0 sm:$0xff] }
  0xcf   :  { %830 = vmatpush.msra.mxu0 %v621_v63  ;;  %969 = vmatpush.msra.mxu2 %v937_v58  ;;  %v935_v63 = vld [vmem:[%s1442_s3 + $0xc8] sm:$0xff] }
  0xd1   :  { %v394_v9 = vpop.f32.mrf.mxu1  ;;  %831 = vmatpush.msra.mxu0 %v619_v6  ;;  %970 = vmatpush.msra.mxu2 %v936_v60  ;;  %v933_v6 = vld [vmem:[%s1442_s3 + $0xb8] sm:$0xff] }
  0xd2   :  { %v395_v2 = vadd.f32 %v394_v9, %v239_v4  ;;  %v414_v11 = vpop.f32.mrf.mxu3  ;;  %v934_v4 = vld [vmem:[%s1442_s3 + $0xc0] sm:$0xff] }
  0xd3   :  { %v434_v12 = vpop.f32.mrf.mxu0  ;;  %832 = vmatpush.msra.mxu0 %v617_v10  ;;  %971 = vmatpush.msra.mxu2 %v935_v63  ;;  %v930_v9 = vld [vmem:[%s1442_s3 + $0xa0] sm:$0xff]  ;;  %v929_v10 = vld [vmem:[%s1442_s3 + $0x98] sm:$0xff] }
  0xd4   :  { %v415_v14 = vadd.f32 %v414_v11, %v395_v2  ;;  %v928_v2 = vld [vmem:[%s1442_s3 + $0x90] sm:$0xff]  ;;  %v927_v11 = vld [vmem:[%s1442_s3 + $0x88] sm:$0xff]  ;;  %v1058_v63 = vld [vmem:[%s1442_s3 + $0x160] sm:$0xff] }
  0xd5   :  { %833 = vmatpush.msra.mxu0 %v615_v13  ;;  %972 = vmatpush.msra.mxu2 %v934_v4  ;;  %v926_v13 = vld [vmem:[%s1442_s3 + $0x80] sm:$0xff] }
  0xd6   :  { %v435_v18 = vadd.f32 %v434_v12, %v415_v14  ;;  %v1105_v12 = vld [vmem:[%s1443_s4 + $0x1] ss:$8 sm:$0x3] }
  0xd7   :  { %834 = vmatpush.msra.mxu0 %v613_v16  ;;  %973 = vmatpush.msra.mxu2 %v933_v6  ;;  %v701_v14 = vperm.slane %v1105_v12, 0  ;;  %v1000_v16 = vld.sshfl [vmem:[#allocation1 + $0x10] sm:$0xff pattern:$0x73625140]  ;;  %v702_v26 = vperm.slane %v1105_v12, 1 }
  0xd8   :  { %v559_v20 = vmax.f32 %v435_v18, 0.0  ;;  %1001 = vrot.lane.b32.xlu0 %v1000_v16, %s1180_s16  ;;  %v1054_v6 = vld [vmem:[%s1443_s4 + $0x3] ss:$0 sm:$0xff] }
  0xd9   :  { %835 = vmatpush.msra.mxu0 %v611_v3  ;;  %v454_v24 = vpop.f32.mrf.mxu2  ;;  %974 = vmatpush.msra.mxu2 %v932_v7 }
  0xda   :  { %764 = vmatmul.f32.vlgmr.msrb.gmra.mxu3 %v559_v20  ;;  %v455_v28 = vadd.f32 %v454_v24, %v240_v23 }
  0xdb   :  { %836 = vmatpush.msra.mxu0 %v609_v21  ;;  %975 = vmatpush.msra.mxu2 %v931_v8 }
  0xdd   :  { %837 = vmatpush.msra.mxu0 %v607_v25  ;;  %976 = vmatpush.msra.mxu2 %v930_v9 }
  0xdf   :  { %838 = vmatpush.msra.mxu0 %v605_v27  ;;  %977 = vmatpush.msra.mxu2 %v929_v10  ;;  %v1065_v10 = vld [vmem:[%s1443_s4 + $0x4] ss:$0 sm:$0xff] }
  0xe1   :  { %v474_v30 = vpop.f32.mrf.mxu0  ;;  %839 = vmatpush.msra.mxu0 %v603_v29  ;;  %978 = vmatpush.msra.mxu2 %v928_v2 }
  0xe2   :  { %v475_v32 = vadd.f32 %v474_v30, %v455_v28  ;;  %864 = vmatmul.f32.vlgmr.msra.gmra.mxu3 %v559_v20 }
  0xe3   :  { %v494_v33 = vpop.f32.mrf.mxu2  ;;  %840 = vmatpush.msra.mxu0 %v601_v31  ;;  %979 = vmatpush.msra.mxu2 %v927_v11 }
  0xe4   :  { %v495_v35 = vadd.f32 %v494_v33, %v475_v32 }
  0xe5   :  { %841 = vmatpush.msra.mxu0 %v599_v34  ;;  %980 = vmatpush.msra.mxu2 %v926_v13 }
  0xe6   :  { %v560_v37 = vmax.f32 %v495_v35, 0.0 }
  0xe7   :  { %842 = vmatpush.msra.mxu0 %v597_v36 }
  0xe8   :  { %784 = vmatmul.f32.vlgmr.msrb.gmra.mxu1 %v560_v37 }
  0xe9   :  { %843 = vmatpush.msra.mxu0 %v595_v38 }
  0xed   :  { %v554_v45 = vpop.f32.mrf.mxu2 }
  0xf0   :  { %884 = vmatmul.f32.vlgmr.msra.gmra.mxu1 %v560_v37 }
  0xf3   :  { %v514_v41 = vpop.f32.mrf.mxu3 }
  0xf4   :  { %v515_v43 = vadd.f32 %v514_v41, %v241_v39  ;;  %v534_v44 = vpop.f32.mrf.mxu1  ;;  %v997_v39 = vld [vmem:[%s1442_s3 + $0x148] sm:$0xff]  ;;  %v996_v41 = vld [vmem:[%s1442_s3 + $0x140] sm:$0xff] }
  0xf5   :  { %1038 = vmatpush.msrb.mxu1 %v997_v39 }
  0xf6   :  { %v535_v46 = vadd.f32 %v534_v44, %v515_v43  ;;  %v998_v43 = vld [vmem:[%s1442_s3 + $0x150] sm:$0x3f]  ;;  %v995_v44 = vld [vmem:[%s1442_s3 + $0x138] sm:$0xff] }
  0xf7   :  { %1109 = vmatpush.msk.msrb.mxu3 %vm1006_vm2, %v998_v43  ;;  %1039 = vmatpush.msrb.mxu1 %v996_v41 }
  0xf8   :  { %v555_v47 = vadd.f32 %v554_v45, %v535_v46  ;;  %v994_v46 = vld [vmem:[%s1442_s3 + $0x130] sm:$0xff] }
  0xf9   :  { %1040 = vmatpush.msrb.mxu1 %v995_v44 }
  0xfa   :  { %v561_v48 = vmax.f32 %v555_v47, 0.0  ;;  %v993_v47 = vld [vmem:[%s1442_s3 + $0x128] sm:$0xff] }
  0xfb   :  { %1041 = vmatpush.msrb.mxu1 %v994_v46 }
  0xfc   :  { %1106 = vmatmul.msk.f32.vlgmr.msrb.gmra.mxu0 %vm254_vm0, %v561_v48  ;;  %1107 = vmatmul.msk.f32.vlgmr.msrb.gmra.mxu2 %vm254_vm0, %v561_v48  ;;  %v992_v48 = vld [vmem:[%s1442_s3 + $0x120] sm:$0xff] }
  0xfd   :  { %945 = vmatpush.msrb.mxu0 %v925_v49  ;;  %1042 = vmatpush.msrb.mxu1 %v993_v47  ;;  %v991_v49 = vld [vmem:[%s1442_s3 + $0x118] sm:$0xff] }
  0xff   :  { %946 = vmatpush.msrb.mxu0 %v924_v15  ;;  %1043 = vmatpush.msrb.mxu1 %v992_v48  ;;  %v990_v15 = vld [vmem:[%s1442_s3 + $0x110] sm:$0xff] }
 0x101   :  { %947 = vmatpush.msrb.mxu0 %v923_v50  ;;  %1044 = vmatpush.msrb.mxu1 %v991_v49  ;;  %v989_v50 = vld [vmem:[%s1442_s3 + $0x108] sm:$0xff] }
 0x103   :  { %948 = vmatpush.msrb.mxu0 %v922_v40  ;;  %1045 = vmatpush.msrb.mxu1 %v990_v15  ;;  %v988_v40 = vld [vmem:[%s1442_s3 + $0x100] sm:$0xff] }
 0x104   :  { %844 = vmatmul.f32.vlgmr.msra.gmra.mxu0 %v558_v42  ;;  %v921_v42 = vld [vmem:[%s1442_s3 + $0x58] sm:$0xff] }
 0x105   :  { %949 = vmatpush.msrb.mxu0 %v921_v42  ;;  %1046 = vmatpush.msrb.mxu1 %v989_v50  ;;  %v987_v42 = vld [vmem:[%s1442_s3 + $0xf8] sm:$0xff] }
 0x107   :  { %950 = vmatpush.msrb.mxu0 %v920_v51  ;;  %1047 = vmatpush.msrb.mxu1 %v988_v40  ;;  %v986_v51 = vld [vmem:[%s1442_s3 + $0xf0] sm:$0xff] }
 0x109   :  { %951 = vmatpush.msrb.mxu0 %v919_v52  ;;  %1048 = vmatpush.msrb.mxu1 %v987_v42  ;;  %v1064_v52 = vld [vmem:[%s1442_s3 + $0x190] sm:$0xff] }
 0x10a   :  { %1078 = vmatpush.msra.mxu3 %v1064_v52 }
 0x10b   :  { %952 = vmatpush.msrb.mxu0 %v918_v53  ;;  %1049 = vmatpush.msrb.mxu1 %v986_v51  ;;  %v1063_v53 = vld [vmem:[%s1442_s3 + $0x188] sm:$0xff] }
 0x10c   :  { %1079 = vmatpush.msra.mxu3 %v1063_v53 }
 0x10d   :  { %953 = vmatpush.msrb.mxu0 %v917_v54  ;;  %v1062_v54 = vld [vmem:[%s1442_s3 + $0x180] sm:$0xff] }
 0x10e   :  { %1080 = vmatpush.msra.mxu3 %v1062_v54 }
 0x10f   :  { %954 = vmatpush.msrb.mxu0 %v916_v57 }
 0x110   :  { %1081 = vmatpush.msra.mxu3 %v1061_v55 }
 0x111   :  { %955 = vmatpush.msrb.mxu0 %v915_v59 }
 0x113   :  { %956 = vmatpush.msrb.mxu0 %v914_v61 }
 0x115   :  { %957 = vmatpush.msrb.mxu0 %v913_v0  ;;  %v1060_v0 = vld [vmem:[%s1442_s3 + $0x170] sm:$0xff] }
 0x116   :  { %1082 = vmatpush.msra.mxu3 %v1060_v0 }
 0x117   :  { %958 = vmatpush.msrb.mxu0 %v912_v62  ;;  %v1059_v62 = vld [vmem:[%s1442_s3 + $0x168] sm:$0xff] }
 0x118   :  { %1083 = vmatpush.msra.mxu3 %v1059_v62 }
 0x119   :  { %959 = vmatpush.msrb.mxu0 %v911_v1  ;;  %v1057_v1 = vld [vmem:[%s1442_s3 + $0x158] sm:$0xff] }
 0x11a   :  { %1084 = vmatpush.msra.mxu3 %v1058_v63 }
 0x11b   :  { %960 = vmatpush.msrb.mxu0 %v910_v5 }
 0x11c   :  { %1085 = vmatpush.msra.mxu3 %v1057_v1 }
 0x145   :  { %v745_v3 = vpop.f32.mrf.mxu2 }
 0x147   :  { %v725_v17 = vpop.f32.mrf.mxu0 }
 0x148   :  { %v726_v18 = vadd.f32 %v725_v17, %v701_v14 }
 0x14a   :  { %v746_v20 = vadd.f32 %v745_v3, %v726_v18  ;;  %v1002_v45 = vpop.permute.xlu0 %1001 }
 0x14b   :  { %1110 = vmatmul.msk.f32.vlgmr.msrb.gmra.mxu3 %vm1003_vm3, %v1002_v45 }
 0x14d   :  { %v825_v28 = vpop.f32.mrf.mxu2 }
 0x14e   :  { %v826_v29 = vadd.f32 %v825_v28, %v702_v26 }
 0x15d   :  { %v765_v19 = vpop.f32.mrf.mxu3 }
 0x15e   :  { %v766_v22 = vadd.f32 %v765_v19, %v746_v20 }
 0x165   :  { %v785_v21 = vpop.f32.mrf.mxu1  ;;  %v865_v32 = vpop.f32.mrf.mxu3 }
 0x166   :  { %v786_v23 = vadd.f32 %v785_v21, %v766_v22 }
 0x16d   :  { %v885_v34 = vpop.f32.mrf.mxu1 }
 0x179   :  { %v805_v24 = vpop.f32.mrf.mxu0 }
 0x17a   :  { %v806_v25 = vadd.f32 %v805_v24, %v786_v23 }
 0x17c   :  { %v908_v27 = vmax.f32 %v806_v25, 0.0 }
 0x17e   :  { %961 = vmatmul.f32.vlgmr.msrb.gmra.mxu0 %v908_v27 }
 0x17f   :  { %v905_v36 = vpop.f32.mrf.mxu2 }
 0x181   :  { %v845_v30 = vpop.f32.mrf.mxu0 }
 0x182   :  { %v846_v31 = vadd.f32 %v845_v30, %v826_v29 }
 0x184   :  { %v866_v33 = vadd.f32 %v865_v32, %v846_v31 }
 0x186   :  { %v886_v35 = vadd.f32 %v885_v34, %v866_v33 }
 0x188   :  { %v906_v37 = vadd.f32 %v905_v36, %v886_v35 }
 0x18a   :  { %v909_v38 = vmax.f32 %v906_v37, 0.0 }
 0x18c   :  { %1108 = vmatmul.msk.f32.vlgmr.msra.gmra.mxu2 %vm941_vm1, %v909_v38 }
 0x1ce   :  { %v1027_v4 = vpop.f32.mrf.mxu3 }
 0x1fb   :  { %v962_v57 = vpop.f32.mrf.mxu0 }
 0x1fc   :  { %v963_v58 = vadd.f32 %v962_v57, %v940_v56 }
 0x20f   :  { %v982_v59 = vpop.f32.mrf.mxu2 }
 0x210   :  { %v983_v60 = vadd.f32 %v982_v59, %v963_v58 }
 0x212   :  { %v985_v61 = vmax.f32 %v983_v60, 0.0 }
 0x214   :  { %1111 = vmatmul.msk.f32.vlgmr.msrb.gmra.mxu1 %vm1030_vm4, %v985_v61 }
 0x291   :  { %v1051_v5 = vpop.f32.mrf.mxu1 }
 0x292   :  { %v1052_v7 = vadd.f32 %v1051_v5, %v1027_v4 }
 0x294   :  { %v1055_v8 = vadd.f32 %v1054_v6, %v1052_v7 }
 0x296   :  { %v1056_v9 = vmax.f32 %v1055_v8, 0.0 }
 0x298   :  { %1112 = vmatmul.msk.f32.vlgmr.msra.gmra.mxu3 %vm1066_vm5, %v1056_v9 }
 0x31b   :  { %v1087_v2 = vpop.f32.mrf.mxu3 }
 0x31c   :  { %v1088_v11 = vadd.f32 %v1087_v2, %v1065_v10 }
 0x31e   :  { %1120 = vtanh.f32 %v1088_v11 }
 0x324   :  { %v1121_v12 = vpop.eup %1120 }
 0x325   :  { %v1091_v13 = vmul.f32 1.5707964, %v1121_v12 }
 0x327   :  { %1093 = vst.msk [vmem:[%s1444_s5] sm:$0x3] %vm1092_vm6, %v1091_v13 }
 0x328   :  { %1098 = vsyncpa [#allocation3], 1 }
 0x329   :  { %1099 = vsyncpa [#allocation5], 1 }

</bundles_post_ra>
